<compile_context>
chip_gen: v7x
topology: tpu7x:2x2x1
jax: 0.10.0
libtpu: 0.0.40
codegen_flags: <defaults>
</compile_context>

<pallas_src>
import math
import functools

import jax
import jax.numpy as jnp
from jax.experimental import pallas as pl
from jax.experimental.pallas import tpu as pltpu


def spatial_attention_kernel(x_ref, bias_ref, wqkv_ref, bqkv_ref, wo_ref, bo_ref,
                             gamma_ref, beta_ref, o_ref, *, num_heads, head_dim):
    H = num_heads * head_dim
    x = x_ref[0]                                          # (N, H) f32
    N = x.shape[0]

    # --- fused QKV projection: one (N,H) x (H,3H) MXU matmul + one bias add.
    #     The softmax scale is already folded into the Q columns/bias wrapper-side. ---
    qkv = jnp.dot(x, wqkv_ref[...], preferred_element_type=jnp.float32) + bqkv_ref[...]

    # --- head split: one minor-dim reshape per operand (no per-head 4-lane slices). ---
    q3 = qkv[:, :H].reshape(N, num_heads, head_dim)       # (N, nh, d)
    k3 = qkv[:, H:2 * H].reshape(N, num_heads, head_dim)  # (N, nh, d)
    v3 = qkv[:, 2 * H:].reshape(N, num_heads, head_dim)   # (N, nh, d)

    # --- single heads-batched score matmul (scale pre-folded) + additive edge-mask bias ---
    s = jnp.einsum("nhd,mhd->hnm", q3, k3,
                   preferred_element_type=jnp.float32)    # (nh, N, N)
    s = s + bias_ref[...]                                 # 0.0 where edge, -1e30 elsewhere

    # --- one stacked softmax for all heads; EXACT division (accuracy requirement) ---
    m = jnp.max(s, axis=-1, keepdims=True)
    e = jnp.exp(s - m)
    p = e / jnp.sum(e, axis=-1, keepdims=True)
    # TODO(synk): dropout(p=0.1) on attention weights is identity here (eval mode).

    # --- single batched P @ V, emitted directly as (N, nh, d); heads merge via one reshape ---
    att = jnp.einsum("hnm,mhd->nhd", p, v3,
                     preferred_element_type=jnp.float32)  # (N, nh, d)
    att2d = att.reshape(N, H)                             # (N, H)

    # --- output projection + residual + two-pass LayerNorm ---
    out = jnp.dot(att2d, wo_ref[...], preferred_element_type=jnp.float32) + bo_ref[...]
    y = x + out

    mu = jnp.mean(y, axis=-1, keepdims=True)
    yc = y - mu
    var = jnp.mean(yc * yc, axis=-1, keepdims=True)       # two-pass: no cancellation hazard
    o_ref[0] = yc * jax.lax.rsqrt(var + 1e-5) * gamma_ref[...] + beta_ref[...]


def spatial_attention(x, mask_bias, params, num_heads):
    B, N, H = x.shape
    head_dim = H // num_heads
    assert H % num_heads == 0

    # Fold the three projection weights/biases into one fused QKV operand (one-time concat),
    # and fold the 1/sqrt(head_dim) softmax scale into the Q columns + bias (free in the MXU).
    scale = 1.0 / math.sqrt(head_dim)
    wqkv = jnp.concatenate([params["wq"] * scale, params["wk"], params["wv"]], axis=1)  # (H, 3H)
    bqkv = jnp.concatenate([params["bq"] * scale, params["bk"], params["bv"]], axis=1)  # (1, 3H)

    kernel = functools.partial(spatial_attention_kernel,
                               num_heads=num_heads, head_dim=head_dim)

    def const2d(shape):
        return pl.BlockSpec(shape, lambda b: (0, 0))

    in_specs = [
        pl.BlockSpec((1, N, H), lambda b: (b, 0, 0)),     # x (one batch slab per step)
        const2d((N, N)),                                  # additive mask bias (0 / -1e30)
        const2d((H, 3 * H)), const2d((1, 3 * H)),         # fused Wqkv, bqkv (scale folded)
        const2d((H, H)), const2d((1, H)),                 # Wo, bo
        const2d((1, H)), const2d((1, H)),                 # ln gamma, ln beta
    ]
    # grid=(B,) "parallel": B=2 lands one batch element on each v7x TensorCore; on single-TC
    # v5e/v6e this costs one extra ~0.35us grid step, accepted to keep one kernel everywhere.
    return pl.pallas_call(
        kernel,
        out_shape=jax.ShapeDtypeStruct((B, N, H), jnp.float32),
        grid_spec=pltpu.PrefetchScalarGridSpec(
            num_scalar_prefetch=0,
            grid=(B,),
            in_specs=in_specs,
            out_specs=pl.BlockSpec((1, N, H), lambda b: (b, 0, 0)),
        ),
        compiler_params=pltpu.CompilerParams(dimension_semantics=("parallel",)),
    )(x, mask_bias, wqkv, bqkv,
      params["wo"], params["bo"], params["gamma"], params["beta"])


def spatial_attention_reference(x, mask_bool, params, num_heads):
    """Pure-JAX reference mirroring the PyTorch forward (eval mode)."""
    B, N, H = x.shape
    d = H // num_heads
    q = x @ params["wq"] + params["bq"][0]
    k = x @ params["wk"] + params["bk"][0]
    v = x @ params["wv"] + params["bv"][0]
    qh = q.reshape(B, N, num_heads, d).transpose(0, 2, 1, 3)
    kh = k.reshape(B, N, num_heads, d).transpose(0, 2, 1, 3)
    vh = v.reshape(B, N, num_heads, d).transpose(0, 2, 1, 3)
    s = jnp.einsum("bhnd,bhmd->bhnm", qh, kh) / math.sqrt(d)
    s = jnp.where(mask_bool[None, None], s, -jnp.inf)
    p = jax.nn.softmax(s, axis=-1)
    att = jnp.einsum("bhnm,bhmd->bhnd", p, vh).transpose(0, 2, 1, 3).reshape(B, N, H)
    out = att @ params["wo"] + params["bo"][0]
    y = x + out
    mu = jnp.mean(y, axis=-1, keepdims=True)
    var = jnp.mean((y - mu) ** 2, axis=-1, keepdims=True)
    return (y - mu) * jax.lax.rsqrt(var + 1e-5) * params["gamma"][0] + params["beta"][0]


if __name__ == "__main__":
    # Make the pure-JAX reference run true-f32 matmuls so the comparison is f32-vs-f32.
    jax.config.update("jax_default_matmul_precision", "highest")

    B, N, H, NUM_HEADS = 2, 16, 32, 8   # batch, num_nodes, hidden_dim, num_heads

    key = jax.random.PRNGKey(0)
    kx, kq, kk, kv, ko, kbq, kbk, kbv, kbo = jax.random.split(key, 9)

    x = jax.random.normal(kx, (B, N, H), dtype=jnp.float32)

    # Deterministic parameter init (synthetic; Linear is used as x @ W + b).
    scale = 1.0 / math.sqrt(H)
    params = {
        "wq": jax.random.normal(kq, (H, H), jnp.float32) * scale,
        "wk": jax.random.normal(kk, (H, H), jnp.float32) * scale,
        "wv": jax.random.normal(kv, (H, H), jnp.float32) * scale,
        "wo": jax.random.normal(ko, (H, H), jnp.float32) * scale,
        "bq": jax.random.normal(kbq, (1, H), jnp.float32) * 0.01,
        "bk": jax.random.normal(kbk, (1, H), jnp.float32) * 0.01,
        "bv": jax.random.normal(kbv, (1, H), jnp.float32) * 0.01,
        "bo": jax.random.normal(kbo, (1, H), jnp.float32) * 0.01,
        "gamma": jnp.ones((1, H), jnp.float32),
        "beta": jnp.zeros((1, H), jnp.float32),
    }

    # Deterministic edge_index: self-loops + ring neighbors (every row has >=1 edge).
    src = jnp.concatenate([jnp.arange(N), jnp.arange(N), jnp.arange(N)])
    dst = jnp.concatenate([jnp.arange(N), (jnp.arange(N) + 1) % N, (jnp.arange(N) - 1) % N])
    edge_index = jnp.stack([src, dst])                     # (2, E)

    mask_bool = jnp.zeros((N, N), dtype=bool).at[edge_index[0], edge_index[1]].set(True)
    # Additive attention bias: 0 where an edge exists, -1e30 elsewhere (finite -> no NaN risk).
    mask_bias = jnp.where(mask_bool, 0.0, -1e30).astype(jnp.float32)

    out = spatial_attention(x, mask_bias, params, NUM_HEADS)
    out = jax.block_until_ready(out)

    ref = spatial_attention_reference(x, mask_bool, params, NUM_HEADS)
    assert out.shape == (B, N, H)
    max_err = float(jnp.max(jnp.abs(out - ref)))
    assert jnp.allclose(out, ref, atol=1e-3, rtol=1e-3), max_err

    print("KERNEL_OK")
</pallas_src>

<mosaic_0001>
module attributes {stable_mosaic.version = 11 : i64} {
  func.func @spatial_attention_kernel(%arg0: i32, %arg1: memref<1x16x32xf32, #tpu.memory_space<vmem>>, %arg2: memref<16x16xf32, #tpu.memory_space<vmem>>, %arg3: memref<32x96xf32, #tpu.memory_space<vmem>>, %arg4: memref<1x96xf32, #tpu.memory_space<vmem>>, %arg5: memref<32x32xf32, #tpu.memory_space<vmem>>, %arg6: memref<1x32xf32, #tpu.memory_space<vmem>>, %arg7: memref<1x32xf32, #tpu.memory_space<vmem>>, %arg8: memref<1x32xf32, #tpu.memory_space<vmem>>, %arg9: memref<1x16x32xf32, #tpu.memory_space<vmem>>) attributes {dimension_semantics = [#tpu.dimension_semantics<parallel>], iteration_bounds = array<i64: 2>, scalar_prefetch = 0 : i64, scratch_operands = 0 : i64, tpu.core_type = #tpu.core_type<tc>, window_params = [{transform_indices = @transform_0, window_bounds = array<i64: 1, 16, 32>}, {pipeline_mode = #tpu.pipeline_mode<synchronous>, transform_indices = @transform_1, window_bounds = array<i64: 16, 16>}, {pipeline_mode = #tpu.pipeline_mode<synchronous>, transform_indices = @transform_2, window_bounds = array<i64: 32, 96>}, {pipeline_mode = #tpu.pipeline_mode<synchronous>, transform_indices = @transform_3, window_bounds = array<i64: 1, 96>}, {pipeline_mode = #tpu.pipeline_mode<synchronous>, transform_indices = @transform_4, window_bounds = array<i64: 32, 32>}, {pipeline_mode = #tpu.pipeline_mode<synchronous>, transform_indices = @transform_5, window_bounds = array<i64: 1, 32>}, {pipeline_mode = #tpu.pipeline_mode<synchronous>, transform_indices = @transform_6, window_bounds = array<i64: 1, 32>}, {pipeline_mode = #tpu.pipeline_mode<synchronous>, transform_indices = @transform_7, window_bounds = array<i64: 1, 32>}, {transform_indices = @transform_8, window_bounds = array<i64: 1, 16, 32>}]} {
    %c0 = arith.constant 0 : index
    %c0_0 = arith.constant 0 : index
    %c0_1 = arith.constant 0 : index
    %0 = vector.load %arg1[%c0, %c0_0, %c0_1] : memref<1x16x32xf32, #tpu.memory_space<vmem>>, vector<1x16x32xf32>
    %1 = vector.shape_cast %0 : vector<1x16x32xf32> to vector<16x32xf32>
    %c0_2 = arith.constant 0 : index
    %c0_3 = arith.constant 0 : index
    %2 = vector.load %arg3[%c0_2, %c0_3] : memref<32x96xf32, #tpu.memory_space<vmem>>, vector<32x96xf32>
    %cst = arith.constant dense<0.000000e+00> : vector<16x96xf32>
    %3 = tpu.matmul %1, %2, %cst {dimension_numbers = #tpu.dot_dimension_numbers<[1], [0], [0], [1], [0, 0, 1, 1], [], []>, precision = #tpu.contract_precision<fp32>} : vector<16x32xf32>, vector<32x96xf32>, vector<16x96xf32> -> vector<16x96xf32>
    %c0_4 = arith.constant 0 : index
    %c0_5 = arith.constant 0 : index
    %4 = vector.load %arg4[%c0_4, %c0_5] : memref<1x96xf32, #tpu.memory_space<vmem>>, vector<1x96xf32>
    %5 = vector.broadcast %4 : vector<1x96xf32> to vector<16x96xf32>
    %6 = arith.addf %3, %5 : vector<16x96xf32>
    %7 = vector.extract_strided_slice %6 {offsets = [0, 0], sizes = [16, 32], strides = [1, 1]} : vector<16x96xf32> to vector<16x32xf32>
    %8 = vector.shape_cast %7 : vector<16x32xf32> to vector<16x8x4xf32>
    %9 = vector.extract_strided_slice %6 {offsets = [0, 32], sizes = [16, 32], strides = [1, 1]} : vector<16x96xf32> to vector<16x32xf32>
    %10 = vector.shape_cast %9 : vector<16x32xf32> to vector<16x8x4xf32>
    %11 = vector.extract_strided_slice %6 {offsets = [0, 64], sizes = [16, 32], strides = [1, 1]} : vector<16x96xf32> to vector<16x32xf32>
    %12 = vector.shape_cast %11 : vector<16x32xf32> to vector<16x8x4xf32>
    "tpu.trace_start"() <{level = 10 : i32, message = "nhd,mhd->hnm"}> : () -> ()
    %cst_6 = arith.constant dense<0.000000e+00> : vector<8x16x16xf32>
    %13 = tpu.matmul %8, %10, %cst_6 {dimension_numbers = #tpu.dot_dimension_numbers<[2], [2], [0], [0], [0, 1, 0, 0, 1, 0], [1], [1]>, precision = #tpu.contract_precision<fp32>} : vector<16x8x4xf32>, vector<16x8x4xf32>, vector<8x16x16xf32> -> vector<8x16x16xf32>
    "tpu.trace_stop"() : () -> ()
    %c0_7 = arith.constant 0 : index
    %c0_8 = arith.constant 0 : index
    %14 = vector.load %arg2[%c0_7, %c0_8] : memref<16x16xf32, #tpu.memory_space<vmem>>, vector<16x16xf32>
    %15 = vector.shape_cast %14 : vector<16x16xf32> to vector<1x16x16xf32>
    %16 = vector.broadcast %15 : vector<1x16x16xf32> to vector<8x16x16xf32>
    %17 = arith.addf %13, %16 : vector<8x16x16xf32>
    %cst_9 = arith.constant dense<0xFF800000> : vector<8x16xf32>
    %18 = vector.multi_reduction <maximumf>, %17, %cst_9 [2] : vector<8x16x16xf32> to vector<8x16xf32>
    %19 = vector.shape_cast %18 : vector<8x16xf32> to vector<8x16x1xf32>
    %20 = vector.broadcast %19 : vector<8x16x1xf32> to vector<8x16x16xf32>
    %21 = arith.subf %17, %20 : vector<8x16x16xf32>
    %22 = math.exp %21 : vector<8x16x16xf32>
    %cst_10 = arith.constant dense<0.000000e+00> : vector<8x16xf32>
    %23 = vector.multi_reduction <add>, %22, %cst_10 [2] : vector<8x16x16xf32> to vector<8x16xf32>
    %24 = vector.shape_cast %23 : vector<8x16xf32> to vector<8x16x1xf32>
    %25 = vector.broadcast %24 : vector<8x16x1xf32> to vector<8x16x16xf32>
    %26 = arith.divf %22, %25 : vector<8x16x16xf32>
    "tpu.trace_start"() <{level = 10 : i32, message = "hnm,mhd->nhd"}> : () -> ()
    %cst_11 = arith.constant dense<0.000000e+00> : vector<8x4x16xf32>
    %27 = tpu.matmul %12, %26, %cst_11 {dimension_numbers = #tpu.dot_dimension_numbers<[0], [2], [2], [1], [0, 1, 0, 2, 1, 1], [1], [0]>, precision = #tpu.contract_precision<fp32>} : vector<16x8x4xf32>, vector<8x16x16xf32>, vector<8x4x16xf32> -> vector<8x4x16xf32>
    %28 = tpu.transpose %27, [2, 0, 1] : vector<8x4x16xf32> -> vector<16x8x4xf32>
    "tpu.trace_stop"() : () -> ()
    %29 = vector.shape_cast %28 : vector<16x8x4xf32> to vector<16x32xf32>
    %c0_12 = arith.constant 0 : index
    %c0_13 = arith.constant 0 : index
    %30 = vector.load %arg5[%c0_12, %c0_13] : memref<32x32xf32, #tpu.memory_space<vmem>>, vector<32x32xf32>
    %cst_14 = arith.constant dense<0.000000e+00> : vector<16x32xf32>
    %31 = tpu.matmul %29, %30, %cst_14 {dimension_numbers = #tpu.dot_dimension_numbers<[1], [0], [0], [1], [0, 0, 1, 1], [], []>, precision = #tpu.contract_precision<fp32>} : vector<16x32xf32>, vector<32x32xf32>, vector<16x32xf32> -> vector<16x32xf32>
    %c0_15 = arith.constant 0 : index
    %c0_16 = arith.constant 0 : index
    %32 = vector.load %arg6[%c0_15, %c0_16] : memref<1x32xf32, #tpu.memory_space<vmem>>, vector<1x32xf32>
    %33 = vector.broadcast %32 : vector<1x32xf32> to vector<16x32xf32>
    %34 = arith.addf %31, %33 : vector<16x32xf32>
    %35 = arith.addf %1, %34 : vector<16x32xf32>
    %cst_17 = arith.constant dense<0.000000e+00> : vector<16xf32>
    %36 = vector.multi_reduction <add>, %35, %cst_17 [1] : vector<16x32xf32> to vector<16xf32>
    %37 = vector.shape_cast %36 : vector<16xf32> to vector<16x1xf32>
    %cst_18 = arith.constant 3.200000e+01 : f32
    %38 = vector.broadcast %cst_18 : f32 to vector<16x1xf32>
    %39 = arith.divf %37, %38 : vector<16x1xf32>
    %40 = vector.broadcast %39 : vector<16x1xf32> to vector<16x32xf32>
    %41 = arith.subf %35, %40 : vector<16x32xf32>
    %42 = arith.mulf %41, %41 : vector<16x32xf32>
    %cst_19 = arith.constant dense<0.000000e+00> : vector<16xf32>
    %43 = vector.multi_reduction <add>, %42, %cst_19 [1] : vector<16x32xf32> to vector<16xf32>
    %44 = vector.shape_cast %43 : vector<16xf32> to vector<16x1xf32>
    %cst_20 = arith.constant 3.200000e+01 : f32
    %45 = vector.broadcast %cst_20 : f32 to vector<16x1xf32>
    %46 = arith.divf %44, %45 : vector<16x1xf32>
    %cst_21 = arith.constant 9.99999974E-6 : f32
    %47 = vector.broadcast %cst_21 : f32 to vector<16x1xf32>
    %48 = arith.addf %46, %47 : vector<16x1xf32>
    %49 = math.rsqrt %48 : vector<16x1xf32>
    %50 = vector.broadcast %49 : vector<16x1xf32> to vector<16x32xf32>
    %51 = arith.mulf %41, %50 : vector<16x32xf32>
    %c0_22 = arith.constant 0 : index
    %c0_23 = arith.constant 0 : index
    %52 = vector.load %arg7[%c0_22, %c0_23] : memref<1x32xf32, #tpu.memory_space<vmem>>, vector<1x32xf32>
    %53 = vector.broadcast %52 : vector<1x32xf32> to vector<16x32xf32>
    %54 = arith.mulf %51, %53 : vector<16x32xf32>
    %c0_24 = arith.constant 0 : index
    %c0_25 = arith.constant 0 : index
    %55 = vector.load %arg8[%c0_24, %c0_25] : memref<1x32xf32, #tpu.memory_space<vmem>>, vector<1x32xf32>
    %56 = vector.broadcast %55 : vector<1x32xf32> to vector<16x32xf32>
    %57 = arith.addf %54, %56 : vector<16x32xf32>
    %c0_26 = arith.constant 0 : index
    %c0_27 = arith.constant 0 : index
    %c0_28 = arith.constant 0 : index
    %58 = vector.load %arg9[%c0_26, %c0_27, %c0_28] : memref<1x16x32xf32, #tpu.memory_space<vmem>>, vector<1x16x32xf32>
    %59 = vector.shape_cast %58 : vector<1x16x32xf32> to vector<16x32xf32>
    %60 = vector.shape_cast %57 : vector<16x32xf32> to vector<1x16x32xf32>
    tpu.vector_store %arg9[%c0_26, %c0_27, %c0_28], %60 {strides = array<i32>} : memref<1x16x32xf32, #tpu.memory_space<vmem>>, vector<1x16x32xf32>,
    return
  }
  func.func @transform_0(%arg0: i32) -> (i32, i32, i32) {
    %c0_i32 = arith.constant 0 : i32
    %c0_i32_0 = arith.constant 0 : i32
    %c0_i32_1 = arith.constant 0 : i32
    return %arg0, %c0_i32, %c0_i32_0 : i32, i32, i32
  }
  func.func @transform_1(%arg0: i32) -> (i32, i32) {
    %c0_i32 = arith.constant 0 : i32
    %c0_i32_0 = arith.constant 0 : i32
    %c0_i32_1 = arith.constant 0 : i32
    return %c0_i32, %c0_i32_0 : i32, i32
  }
  func.func @transform_2(%arg0: i32) -> (i32, i32) {
    %c0_i32 = arith.constant 0 : i32
    %c0_i32_0 = arith.constant 0 : i32
    %c0_i32_1 = arith.constant 0 : i32
    return %c0_i32, %c0_i32_0 : i32, i32
  }
  func.func @transform_3(%arg0: i32) -> (i32, i32) {
    %c0_i32 = arith.constant 0 : i32
    %c0_i32_0 = arith.constant 0 : i32
    %c0_i32_1 = arith.constant 0 : i32
    return %c0_i32, %c0_i32_0 : i32, i32
  }
  func.func @transform_4(%arg0: i32) -> (i32, i32) {
    %c0_i32 = arith.constant 0 : i32
    %c0_i32_0 = arith.constant 0 : i32
    %c0_i32_1 = arith.constant 0 : i32
    return %c0_i32, %c0_i32_0 : i32, i32
  }
  func.func @transform_5(%arg0: i32) -> (i32, i32) {
    %c0_i32 = arith.constant 0 : i32
    %c0_i32_0 = arith.constant 0 : i32
    %c0_i32_1 = arith.constant 0 : i32
    return %c0_i32, %c0_i32_0 : i32, i32
  }
  func.func @transform_6(%arg0: i32) -> (i32, i32) {
    %c0_i32 = arith.constant 0 : i32
    %c0_i32_0 = arith.constant 0 : i32
    %c0_i32_1 = arith.constant 0 : i32
    return %c0_i32, %c0_i32_0 : i32, i32
  }
  func.func @transform_7(%arg0: i32) -> (i32, i32) {
    %c0_i32 = arith.constant 0 : i32
    %c0_i32_0 = arith.constant 0 : i32
    %c0_i32_1 = arith.constant 0 : i32
    return %c0_i32, %c0_i32_0 : i32, i32
  }
  func.func @transform_8(%arg0: i32) -> (i32, i32, i32) {
    %c0_i32 = arith.constant 0 : i32
    %c0_i32_0 = arith.constant 0 : i32
    %c0_i32_1 = arith.constant 0 : i32
    return %arg0, %c0_i32, %c0_i32_0 : i32, i32, i32
  }
}

</mosaic_0001>

<bundles_post_ra>
// kernel: tpu_custom_call.1
= control target key start
LH: loop header
LB: loop body
LE: loop exit
PB: predicated region body
PF: predicated region fallthrough
CT: control target
= control target key end

     0   :  { %13 = vsyncpa [#allocation3], 0  ;;  %s14260_s0 = inlined_call_operand.hbm [shape: f32[2,16,32], index: 0, kind: input, shape index: {}]   ;;  %s14261_s1 = inlined_call_operand.hbm [shape: f32[16,16], index: 1, kind: input, shape index: {}]   ;;  %s14262_s2 = inlined_call_operand.hbm [shape: f32[32,96], index: 2, kind: input, shape index: {}]   ;;  %s14263_s3 = inlined_call_operand.vmem [shape: f32[1,96], index: 3, kind: input, shape index: {}]   ;;  %s14264_s4 = inlined_call_operand.hbm [shape: f32[32,32], index: 4, kind: input, shape index: {}]   ;;  %s14265_s5 = inlined_call_operand.vmem [shape: f32[1,32], index: 5, kind: input, shape index: {}]   ;;  %s14266_s6 = inlined_call_operand.vmem [shape: f32[1,32], index: 6, kind: input, shape index: {}]   ;;  %s14267_s7 = inlined_call_operand.vmem [shape: f32[1,32], index: 7, kind: input, shape index: {}]   ;;  %s14268_s8 = inlined_call_operand.hbm [shape: f32[2,16,32], index: 8, kind: output, shape index: {}]  }
   0x1   :  { %15 = vsyncpa [#allocation3 + $0x1], 0 }
   0x2   :  { %16 = vsyncpa [#allocation6], 0 }
   0x3   :  { %17 = vsyncpa [#allocation9], 0 }
   0x4   :  { %18 = vsyncpa [#allocation4], 0 }
   0x5   :  { %20 = vsyncpa [#allocation4 + $0x1], 0  ;;  %s13016_s27 = smov 0   ;;  %s13018_s28 = smov 0  }
   0x6   :  { %s13020_s29 = smov 0   ;;  %s13022_s30 = smov 0  }
   0x7 LB: > { %14274 = sst [smem:[#allocation15_spill]] %s12928_s27  ;;  %s13037_s9 = sadd.s32 4294967295, %s12940_s30   ;;  %s12940_s30 = sphi %s13022_s30, %s14297_s30   ;;  %s12936_s29 = sphi %s13020_s29, %s14296_s29   ;;  %s12932_s28 = sphi %s13018_s28, %s14295_s28   ;;  %s12928_s27 = sphi %s13016_s27, %s14294_s27  }
   0x8   : > { %s11032_s10 = sadd.s32 4294967294, %s12940_s30   ;;  %p46_p0 = scmp.ne.s32.totalorder %s12932_s28, %s12928_s27 }
   0x9   : > { %p14269_p1 = scmp.eq.s32.totalorder %s13037_s9, 0  ;;  %p223_p3 = scmp.eq.s32.totalorder %s11032_s10, 1 }
   0xa   : > { %p11033_p5 = scmp.ge.s32.totalorder %s12940_s30, 1  ;;  %p230_p7 = scmp.lt.s32.totalorder %s12940_s30, 3 }
   0xb   : > { %p13046_p4 = por %p14269_p1, %p46_p0  ;;  %p13051_p6 = por %p223_p3, %p46_p0 }
   0xc   : > { %p13056_p8 = pnand %p11033_p5, %p230_p7  ;;  %s12942_s14 = smov [#allocation5]  }
   0xd   : > { %s14275_s11 = scalar_select %p13046_p4, 1, 0 }
   0xe   : > { %s14276_s12 = scalar_select %p13051_p6, 1, 0 }
   0xf   : > { %s14278_s13 = scalar_select %p13056_p8, 1, 0 }
  0x10   : > { %14277 = sst [smem:[#allocation16_spill]] %s14276_s12  ;;  %s242_s15 = sshll.u32 %s12942_s14, 4  ;;  %s13060_s15 = int_to_ptr.vmem [resolvable:$true] %s242_s15 }
  0x11   : > { %p12597_p9 = pneg %p13056_p8  ;;  %s12943_s17 = smov [#allocation7]  }
  0x12   : > { %s255_s18 = sshll.u32 %s12943_s17, 4  ;;  %s12944_s19 = smov [#allocation8]   ;;  %s13071_s18 = int_to_ptr.vmem [resolvable:$true] %s255_s18 }
  0x13   : > { %p13067_p11 = pnand %p12597_p9, %p14269_p1  ;;  %s13073_s20 = sshll.u32 %s12944_s19, 4  ;;  %s272_s20 = int_to_ptr.vmem [resolvable:$true] %s13073_s20 }
  0x14   : > { %s12752_s23 = scalar_lea.hbm %s14261_s1, 256 }
  0x15   : > { %p12753_p12 = scmp.ne.s32.totalorder %s14261_s1, %s12752_s23  ;;  %p13083_p13 = pneg %p13067_p11 }
  0x16   : > { %p12759_p5 = scmp.lt.u32.totalorder %s12752_s23, %s14261_s1 }
  0x17   : > { %p12755_p0 = pnand %p13083_p13, %p12753_p12 }
  0x19   : > { %p12756_p3 = pneg %p12755_p0 }
  0x1b   : > { %p12761_p7 = pnand %p12759_p5, %p12756_p3 }
  0x1d   : > { %12764 = shalt.err (!%p12761_p7)
}
  0x1e   : > { %s12765_s17 = scalar_lea.vmem %s13060_s15, 256  ;;  %p12773_p2 = scmp.lt.s32.totalorder %s13060_s15, %s13060_s15 }
  0x1f   : > { %p12766_p9 = scmp.ne.s32.totalorder %s13060_s15, %s12765_s17  ;;  %p12774_p6 = scmp.lt.s32.totalorder %s12765_s17, %s12765_s17 }
  0x21   : > { %p12768_p10 = pnand %p12766_p9, %p13083_p13  ;;  %p12775_p12 = por %p12774_p6, %p12773_p2 }
  0x23   : > { %p12769_p1 = pneg %p12768_p10 }
  0x25   : > { %p12776_p0 = pnand %p12775_p12, %p12769_p1 }
  0x27   : > { %12779 = shalt.err (!%p12776_p0)
}
  0x28   : > { %s12945_s19 = smov 128   ;;  %s12946_s21 = smov 8  }
  0x29   : > { %12600 = dma.hbm_to_vmem [thread:$0]  (!%p13067_p11), %s14261_s1, 256, %s13060_s15, [#allocation6], %s12945_s19, %s12945_s19, %s12946_s21  }
  0x2a   : > { %s12780_s10 = scalar_lea.hbm %s14262_s2, 512 }
  0x2b   : > { %p12781_p1 = scmp.ne.s32.totalorder %s14262_s2, %s12780_s10  ;;  %p12787_p10 = scmp.lt.u32.totalorder %s12780_s10, %s14262_s2 }
  0x2d   : > { %p12783_p2 = pnand %p12781_p1, %p13083_p13 }
  0x2f   : > { %p12784_p6 = pneg %p12783_p2 }
  0x31   : > { %p12789_p3 = pnand %p12787_p10, %p12784_p6 }
  0x33   : > { %12792 = shalt.err (!%p12789_p3)
}
  0x34   : > { %s12793_s15 = scalar_lea.vmem %s13071_s18, 512  ;;  %p12801_p12 = scmp.lt.s32.totalorder %s13071_s18, %s13071_s18 }
  0x35   : > { %p12794_p5 = scmp.ne.s32.totalorder %s13071_s18, %s12793_s15  ;;  %p12802_p0 = scmp.lt.s32.totalorder %s12793_s15, %s12793_s15 }
  0x37   : > { %p12796_p7 = pnand %p12794_p5, %p13083_p13  ;;  %p12803_p1 = por %p12802_p0, %p12801_p12 }
  0x39   : > { %p12797_p9 = pneg %p12796_p7 }
  0x3b   : > { %p12804_p2 = pnand %p12803_p1, %p12797_p9 }
  0x3d   : > { %12807 = shalt.err (!%p12804_p2)
}
  0x3e   : > { %12603 = dma.hbm_to_vmem [thread:$0]  (!%p13067_p11), %s14262_s2, 512, %s13071_s18, [#allocation6], %s12945_s19, %s12945_s19, %s12946_s21  }
  0x3f   : > { %s12808_s24 = scalar_lea.hbm %s14264_s4, 512 }
  0x40   : > { %p12809_p6 = scmp.ne.s32.totalorder %s14264_s4, %s12808_s24  ;;  %p12815_p5 = scmp.lt.u32.totalorder %s12808_s24, %s14264_s4 }
  0x42   : > { %p12811_p10 = pnand %p12809_p6, %p13083_p13 }
  0x44   : > { %p12812_p3 = pneg %p12811_p10 }
  0x46   : > { %p12817_p7 = pnand %p12815_p5, %p12812_p3 }
  0x48   : > { %12820 = shalt.err (!%p12817_p7)
}
  0x49   : > { %s12821_s15 = scalar_lea.vmem %s272_s20, 512  ;;  %p12829_p1 = scmp.lt.s32.totalorder %s272_s20, %s272_s20 }
  0x4a   : > { %p12822_p9 = scmp.ne.s32.totalorder %s272_s20, %s12821_s15  ;;  %p12830_p2 = scmp.lt.s32.totalorder %s12821_s15, %s12821_s15 }
  0x4c   : > { %p12824_p12 = pnand %p12822_p9, %p13083_p13  ;;  %p12831_p4 = por %p12830_p2, %p12829_p1 }
  0x4e   : > { %p12825_p0 = pneg %p12824_p12 }
  0x50   : > { %p12832_p8 = pnand %p12831_p4, %p12825_p0 }
  0x52   : > { %12835 = shalt.err (!%p12832_p8)
}
  0x53   : > { %12606 = dma.hbm_to_vmem [thread:$0]  (!%p13067_p11), %s14264_s4, 512, %s272_s20, [#allocation9], %s12945_s19, %s12945_s19, %s12946_s21  }
  0x54   : > { %s13156_s26 = sadd.s32 1, %s12940_s30   ;;  %s33_s12 = sadd.s32 1, %s12936_s29 }
  0x55   : > { %s30_s16 = ssub.s32 %s12940_s30, %s13156_s26  ;;  %p40_p8 = scmp.ne.s32.totalorder %s12936_s29, %s12932_s28 }
  0x56   : > { %p31_p4 = scmp.eq.s32.totalorder %s30_s16, 0  ;;  %p41_p13 = scmp.eq.s32.totalorder %s12940_s30, 0 }
  0x57   : > { %p12618_p6 = scmp.lt.s32.totalorder %s12940_s30, 2  ;;  %p14281_p3 = scmp.eq.s32.totalorder %s13037_s9, 1 }
  0x58   : > { %s13166_s22 = scalar_select %p31_p4, %s12936_s29, %s33_s12  }
  0x59   : > { %p42_p10 = por %p41_p13, %p40_p8  ;;  %p13170_p5 = por %p14281_p3, %p40_p8 }
  0x5a   : > { %s294_s24 = sand.u32 1, %s12936_s29   ;;  %s11072_s25 = sshll.u32 %s12940_s30, 8 }
  0x5b   : > { %s11038_s20 = sshll.u32 %s294_s24, 4  ;;  %s13179_s17 = scalar_lea.hbm %s14260_s0, %s11072_s25 }
  0x5c   : > { %s298_s15 = scalar_lea.vmem [#allocation2], %s11038_s20  ;;  %p13181_p11 = pnand %p12618_p6, %p42_p10 }
  0x5d   : > { %s305_s18 = sshll.u32 %s298_s15, 4  ;;  %s13187_s16 = scalar_lea.sflag [#allocation3], %s294_s24  ;;  %s13185_s18 = int_to_ptr.vmem [resolvable:$true] %s305_s18 }
  0x5e   : > { %s12836_s12 = scalar_lea.hbm %s13179_s17, 256  ;;  %p12838_p9 = pneg %p13181_p11 }
  0x5f   : > { %p12837_p7 = scmp.ne.s32.totalorder %s13179_s17, %s12836_s12  ;;  %s12841_s10 = scalar_lea.hbm %s14260_s0, 512 }
  0x60   : > { %p12842_p1 = scmp.lt.u32.totalorder %s13179_s17, %s14260_s0  ;;  %p12843_p2 = scmp.lt.u32.totalorder %s12841_s10, %s12836_s12 }
  0x61   : > { %p12839_p12 = pnand %p12838_p9, %p12837_p7  ;;  %p12845_p8 = scmp.lt.u32.totalorder %s12836_s12, %s13179_s17 }
  0x62   : > { %p12844_p4 = por %p12843_p2, %p12842_p1 }
  0x63   : > { %p12840_p0 = pneg %p12839_p12 }
  0x64   : > { %p12846_p13 = por %p12845_p8, %p12844_p4 }
  0x66   : > { %p12847_p6 = pnand %p12846_p13, %p12840_p0 }
  0x68   : > { %12850 = shalt.err (!%p12847_p6)
}
  0x69   : > { %s12851_s24 = scalar_lea.vmem %s13185_s18, 256  ;;  %s12947_s25 = smov [#allocation2]  }
  0x6a   : > { %p12852_p10 = scmp.ne.s32.totalorder %s13185_s18, %s12851_s24  ;;  %s12856_s20 = sshll.u32 %s12947_s25, 4  ;;  %s12857_s20 = int_to_ptr.vmem [resolvable:$false] %s12856_s20 }
  0x6b   : > { %s12858_s14 = scalar_lea.vmem %s12857_s20, 512  ;;  %p12859_p12 = scmp.lt.s32.totalorder %s13185_s18, %s12857_s20 }
  0x6c   : > { %p12854_p3 = pnand %p12852_p10, %p12838_p9  ;;  %p12860_p1 = scmp.lt.s32.totalorder %s12858_s14, %s12851_s24 }
  0x6e   : > { %p12855_p7 = pneg %p12854_p3  ;;  %p12861_p2 = por %p12860_p1, %p12859_p12 }
  0x70   : > { %p12862_p4 = pnand %p12861_p2, %p12855_p7 }
  0x72   : > { %12865 = shalt.err (!%p12862_p4)
}
  0x73   : > { %12610 = dma.hbm_to_vmem [thread:$0]  (!%p13181_p11), %s13179_s17, 256, %s13185_s18, %s13187_s16, %s12945_s19, %s12945_s19, %s12946_s21  }
  0x74   : > { %p14284_p9 = scmp.ne.s32.totalorder %s14278_s13, 0 }
  0x75   : > { %s13221_s12 = sand.u32 (!%p14284_p9), 1, %s12932_s28   ;;  %p14285_p0 = scmp.ne.s32.totalorder (!%p14284_p9), %s14275_s11, 0 }
  0x76   : > { %317 = sbr.rel (%p14284_p9) target bundleno = 2970 (0xb9a), region = 52  ;;  %s11042_s10 = sshll.u32 (!%p14284_p9), %s13221_s12, 4 }
  0x77   : > { %s320_s15 = scalar_lea.sflag (!%p14284_p9), [#allocation3], %s13221_s12  ;;  %s13227_s27 = scalar_lea.vmem (!%p14284_p9), [#allocation2], %s11042_s10 }
  0x7d   : > { %12911 = dma.done.wait (%p14285_p0), %s320_s15, 256  }
  0x7e   : > { %12913 = vsyncadd (%p14285_p0), %s320_s15, 4294967040  ;;  %p14286_p11 = scmp.eq.s32.totalorder %s13037_s9, 0 }
  0x80   : > { %12915 = dma.done.wait (%p14286_p11), [#allocation6], 768   ;;  %p14287_p8 = pmov %p14286_p11 }
  0x82   : > { %12917 = vsyncadd (%p14287_p8), [#allocation6], 4294966528  ;;  %p14288_p13 = pmov %p14287_p8 }
  0x83   : > { %p14289_p6 = pmov %p14287_p8 }
  0x84   : > { %12919 = dma.done.wait (%p14288_p13), [#allocation9], 512  }
  0x85   : > { %12921 = vsyncadd (%p14289_p6), [#allocation9], 4294966784  ;;  %vm381_vm0 = vcmask 261120   ;;  %v370_v0 = vld [vmem:[#allocation7] sm:$0xff]  ;;  %v371_v1 = vld [vmem:[#allocation7 + $0x8] sm:$0xff]  ;;  %vm1252_vm1 = vcmask 31744  }
  0x86   : > { %v372_v2 = vld [vmem:[#allocation7 + $0x10] sm:$0xff]  ;;  %v389_v3 = vand.u32 4294901760, %v370_v0  ;;  %v392_v4 = vand.u32 4294901760, %v371_v1  ;;  %v373_v5 = vld [vmem:[#allocation7 + $0x18] sm:$0xff]  ;;  %s12948_s19 = smov 96   ;;  %s12949_s21 = smov 124  }
  0x87   : > { %v395_v6 = vand.u32 4294901760, %v372_v2  ;;  %v368_v7 = vld [vmem:[%s13227_s27] sm:$0xff]  ;;  %v369_v8 = vld [vmem:[%s13227_s27 + $0x8] sm:$0xff]  ;;  %v398_v9 = vand.u32 4294901760, %v373_v5  ;;  %s12950_s17 = smov 116   ;;  %s12951_s18 = smov 120  }
  0x88   : > { %v383_v10 = vsel %vm381_vm0, %v368_v7, 0  ;;  %v386_v11 = vsel %vm381_vm0, %v369_v8, 0  ;;  %v13245_v12 = vpack.c.bf16 %v392_v4, %v389_v3  ;;  %v479_v15 = vsub.f32 %v370_v0, %v389_v3  ;;  %v11047_v46 = vld [vmem:[%s14263_s3] ss:$0 sm:$0xff]  ;;  %s12952_s16 = smov 112   ;;  %s12953_s24 = smov 108  }
  0x89   : > { %v13247_v13 = vand.u32 4294901760, %v383_v10  ;;  %v13249_v14 = vand.u32 4294901760, %v386_v11  ;;  %v13251_v16 = vpack.c.bf16 %v398_v9, %v395_v6  ;;  %v486_v17 = vsub.f32 %v371_v1, %v392_v4  ;;  %s12954_s25 = smov 104   ;;  %s12955_s20 = smov 100  }
  0x8a   : > { %v493_v18 = vsub.f32 %v372_v2, %v395_v6  ;;  %v500_v19 = vsub.f32 %v373_v5, %v398_v9  ;;  %12143 = vmatprep.subr.bf16.mxu0 %v13245_v12  ;;  %v480_v22 = vand.u32 4294901760, %v479_v15  ;;  %vm1257_vm2 = vcmask 1043456   ;;  %s12956_s14 = smov 64   ;;  %s12962_s15 = smov 4  }
  0x8b   : > { %v458_v20 = vsub.f32 %v383_v10, %v13247_v13  ;;  %v468_v21 = vsub.f32 %v386_v11, %v13249_v14  ;;  %12145 = vmatpush3.bf16.msra.mxu0 %v13245_v12  ;;  %v487_v23 = vand.u32 4294901760, %v486_v17  ;;  %v12158_v42 = vpack.c.bf16 %v486_v17, %v479_v15  ;;  %s12963_s11 = smov 12   ;;  %s12964_s13 = smov 8  }
  0x8c   : > { %v494_v24 = vand.u32 4294901760, %v493_v18  ;;  %v501_v25 = vand.u32 4294901760, %v500_v19  ;;  %12147 = vmatprep.subr.bf16.mxu0 %v13251_v16  ;;  %v481_v28 = vsub.f32 %v479_v15, %v480_v22  ;;  %v12162_v43 = vpack.c.bf16 %v500_v19, %v493_v18 }
  0x8d   : > { %v459_v26 = vand.u32 4294901760, %v458_v20  ;;  %v469_v27 = vand.u32 4294901760, %v468_v21  ;;  %v488_v29 = vsub.f32 %v486_v17, %v487_v23  ;;  %v12174_v44 = vpack.c.bf16 %v487_v23, %v480_v22 }
  0x8e   : > { %v495_v30 = vsub.f32 %v493_v18, %v494_v24  ;;  %v502_v31 = vsub.f32 %v500_v19, %v501_v25  ;;  %v482_v34 = vand.u32 4294901760, %v481_v28  ;;  %v12178_v45 = vpack.c.bf16 %v501_v25, %v494_v24 }
  0x8f   : > { %v460_v32 = vsub.f32 %v458_v20, %v459_v26  ;;  %v470_v33 = vsub.f32 %v468_v21, %v469_v27  ;;  %12149 = vmatpush3.bf16.msra.mxu0 %v13251_v16  ;;  %v489_v35 = vand.u32 4294901760, %v488_v29  ;;  %vm5222_vm3 = vcmask 130048  }
  0x90   : > { %v496_v36 = vand.u32 4294901760, %v495_v30  ;;  %v503_v37 = vand.u32 4294901760, %v502_v31  ;;  %vm12958_vm4 = vmmov 0   ;;  %vm10305_vm5 = vcmask 64512  }
  0x91   : > { %v461_v38 = vand.u32 4294901760, %v460_v32  ;;  %v471_v39 = vand.u32 4294901760, %v470_v33  ;;  %v12150_v40 = vpack.c.bf16 %v489_v35, %v482_v34  ;;  %vm10308_vm6 = vcmask 97280  }
  0x92   : > { %v12154_v41 = vpack.c.bf16 %v503_v37, %v496_v36  ;;  %vm10313_vm7 = vcmask 162816   ;;  %vm10316_vm8 = vcmask 195584   ;;  %vm10319_vm9 = vcmask 228352  }
  0x93   : > { %11442 = vmatprep.mubr.f32.mxu0 %v461_v38  ;;  %12151 = vmatprep.subr.bf16.mxu0 %v12150_v40 }
  0x94   : > { %11443 = vmatmul.mubr.f32.vlgmr.msra.gmra.mrb[0].mxu0 %v471_v39 }
  0x95   : > { %12153 = vmatpush3.bf16.msra.mxu0 %v12150_v40  ;;  %11453 = vmatprep.mubr.f32.mxu0 %v13247_v13 }
  0x96   : > { %12155 = vmatprep.subr.bf16.mxu0 %v12154_v41 }
  0x99   : > { %12157 = vmatpush3.bf16.msra.mxu0 %v12154_v41 }
  0x9a   : > { %12159 = vmatprep.subr.bf16.mxu0 %v12158_v42 }
  0x9c   : > { %11454 = vmatmul.mubr.f32.vlgmr.msra.gmra.mrb[0].mxu0 %v13249_v14 }
  0x9d   : > { %12161 = vmatpush3.bf16.msra.mxu0 %v12158_v42  ;;  %11464 = vmatprep.mubr.f32.mxu0 %v458_v20 }
  0x9e   : > { %12163 = vmatprep.subr.bf16.mxu0 %v12162_v43 }
  0xa1   : > { %12165 = vmatpush3.bf16.msra.mxu0 %v12162_v43 }
  0xa2   : > { %12167 = vmatprep.subr.bf16.mxu0 %v13245_v12 }
  0xa4   : > { %11465 = vmatmul.mubr.f32.vlgmr.msra.gmra.mrb[0].mxu0 %v468_v21 }
  0xa5   : > { %12169 = vmatpush3.bf16.msra.mxu0 %v13245_v12  ;;  %11475 = vmatprep.mubr.f32.mxu0 %v459_v26 }
  0xa6   : > { %12171 = vmatprep.subr.bf16.mxu0 %v13251_v16 }
  0xa9   : > { %12173 = vmatpush3.bf16.msra.mxu0 %v13251_v16 }
  0xaa   : > { %12175 = vmatprep.subr.bf16.mxu0 %v12174_v44 }
  0xac   : > { %11476 = vmatmul.mubr.f32.vlgmr.msra.gmra.mrb[0].mxu0 %v469_v27 }
  0xad   : > { %12177 = vmatpush3.bf16.msra.mxu0 %v12174_v44  ;;  %11486 = vmatprep.mubr.f32.mxu0 %v13247_v13 }
  0xae   : > { %12179 = vmatprep.subr.bf16.mxu0 %v12178_v45 }
  0xb1   : > { %12181 = vmatpush3.bf16.msra.mxu0 %v12178_v45 }
  0xb2   : > { %12183 = vmatprep.subr.bf16.mxu0 %v13245_v12 }
  0xb4   : > { %11487 = vmatmul.mubr.f32.vlgmr.msra.gmra.mrb[0].mxu0 %v13249_v14 }
  0xb5   : > { %12185 = vmatpush3.bf16.msra.mxu0 %v13245_v12  ;;  %11497 = vmatprep.mubr.f32.mxu0 %v13247_v13 }
  0xb6   : > { %12187 = vmatprep.subr.bf16.mxu0 %v13251_v16 }
  0xb9   : > { %12189 = vmatpush3.bf16.msra.mxu0 %v13251_v16 }
  0xbc   : > { %11498 = vmatmul.mubr.f32.vlgmr.msra.gmra.mrb[0].mxu0 %v13249_v14 }
 0x18f   : > { %v11499_v47 = vpop.f32.mrb[0].mxu0 }
 0x190   : > { %v13276_v48 = vadd.f32 %v11499_v47, %v11047_v46  ;;  %v906_v49 = vpop.f32.mrb[1].mxu0 }
 0x191   : > { %v13278_v50 = vadd.f32 %v11047_v46, %v906_v49 }
 0x192   : > { %950 = vrot.lane.b32.xlu1 %v13276_v48, %s12948_s19  ;;  %920 = vrot.lane.b32.xlu0 %v13276_v48, %s12949_s21  ;;  %v1255_v15 = vsel %vm1252_vm1, %v13276_v48, 0 }
 0x193   : > { %v1253_v51 = vsel %vm1252_vm1, %v13278_v50, 0  ;;  %v1337_v16 = vand.u32 4294901760, %v1255_v15 }
 0x194   : > { %v13285_v52 = vand.u32 4294901760, %v1253_v51 }
 0x195   : > { %v1338_v17 = vsub.f32 %v1255_v15, %v1337_v16 }
 0x196   : > { %928 = vrot.lane.b32.xlu1 %v13276_v48, %s12950_s17  ;;  %924 = vrot.lane.b32.xlu0 %v13276_v48, %s12951_s18  ;;  %v13290_v53 = vsub.f32 %v1253_v51, %v13285_v52 }
 0x197   : > { %v1339_v18 = vand.u32 4294901760, %v1338_v17 }
 0x198   : > { %v1329_v54 = vand.u32 4294901760, %v13290_v53 }
 0x199   : > { %v1340_v20 = vsub.f32 %v1338_v17, %v1339_v18 }
 0x19a   : > { %932 = vrot.lane.b32.xlu1 %v13276_v48, %s12952_s16  ;;  %918 = vrot.lane.b32.xlu0 %v13278_v50, %s12949_s21  ;;  %v1330_v55 = vsub.f32 %v13290_v53, %v1329_v54  ;;  %s12966_s21 = smov 20  }
 0x19b   : > { %v1341_v24 = vand.u32 4294901760, %v1340_v20 }
 0x19c   : > { %v1331_v56 = vand.u32 4294901760, %v1330_v55 }
 0x19e   : > { %936 = vrot.lane.b32.xlu1 %v13276_v48, %s12953_s24  ;;  %922 = vrot.lane.b32.xlu0 %v13278_v50, %s12951_s18  ;;  %s12968_s18 = smov 28  }
 0x19f   : > { %11502 = vmatprep.mubr.f32.mxu1 %v1331_v56 }
 0x1a2   : > { %948 = vrot.lane.b32.xlu1 %v13278_v50, %s12948_s19  ;;  %938 = vrot.lane.b32.xlu0 %v13278_v50, %s12954_s25 }
 0x1a6   : > { %926 = vrot.lane.b32.xlu1 %v13278_v50, %s12950_s17  ;;  %942 = vrot.lane.b32.xlu0 %v13278_v50, %s12955_s20  ;;  %s12967_s17 = smov 24  }
 0x1aa   : > { %930 = vrot.lane.b32.xlu1 %v13278_v50, %s12952_s16 }
 0x1ae   : > { %934 = vrot.lane.b32.xlu1 %v13278_v50, %s12953_s24 }
 0x204   : > { %v951_v57 = vpop.permute.xlu1 %950  ;;  %v13308_v58 = vpop.permute.xlu0 %920 }
 0x205   : > { %954 = vrot.lane.b32.xlu1 %v13308_v58, %s12948_s19  ;;  %v1752_v38 = vsel %vm1252_vm1, %v13308_v58, 0 }
 0x206   : > { %v1833_v39 = vand.u32 4294901760, %v1752_v38 }
 0x208   : > { %v13312_v59 = vpop.permute.xlu1 %928  ;;  %v13314_v60 = vpop.permute.xlu0 %924  ;;  %v1834_v40 = vsub.f32 %v1752_v38, %v1833_v39 }
 0x209   : > { %958 = vrot.lane.b32.xlu1 %v13314_v60, %s12948_s19 }
 0x20a   : > { %v1835_v41 = vand.u32 4294901760, %v1834_v40 }
 0x20c   : > { %v13318_v61 = vpop.permute.xlu1 %932  ;;  %v13320_v62 = vpop.permute.xlu0 %918  ;;  %v1836_v43 = vsub.f32 %v1834_v40, %v1835_v41 }
 0x20d   : > { %962 = vrot.lane.b32.xlu1 %v13312_v59, %s12948_s19  ;;  %952 = vrot.lane.b32.xlu0 %v13320_v62, %s12948_s19  ;;  %v1750_v30 = vsel %vm1252_vm1, %v13320_v62, 0 }
 0x20e   : > { %v13381_v32 = vand.u32 4294901760, %v1750_v30  ;;  %v1837_v49 = vand.u32 4294901760, %v1836_v43  ;;  %v2248_v43 = vsel %vm1252_vm1, %v13314_v60, 0 }
 0x210   : > { %v13326_v63 = vpop.permute.xlu1 %936  ;;  %v13328_v0 = vpop.permute.xlu0 %922  ;;  %v1824_v34 = vsub.f32 %v1750_v30, %v13381_v32 }
 0x211   : > { %956 = vrot.lane.b32.xlu1 %v13328_v0, %s12948_s19 }
 0x212   : > { %v1825_v35 = vand.u32 4294901760, %v1824_v34 }
 0x214   : > { %v949_v1 = vpop.permute.xlu1 %948  ;;  %v13360_v11 = vpop.permute.xlu0 %938  ;;  %v1826_v36 = vsub.f32 %v1824_v34, %v1825_v35 }
 0x216   : > { %v1827_v37 = vand.u32 4294901760, %v1826_v36 }
 0x218   : > { %v13332_v2 = vpop.permute.xlu1 %926  ;;  %v13364_v12 = vpop.permute.xlu0 %942 }
 0x219   : > { %v2742_v3 = vsel %vm1252_vm1, %v13332_v2, 0  ;;  %960 = vrot.lane.b32.xlu1 %v13332_v2, %s12948_s19 }
 0x21a   : > { %v13338_v4 = vand.u32 4294901760, %v2742_v3 }
 0x21c   : > { %v13341_v5 = vsub.f32 %v2742_v3, %v13338_v4  ;;  %v13348_v9 = vpop.permute.xlu1 %930  ;;  %v2246_v3 = vsel %vm1252_vm1, %v13328_v0, 0 }
 0x21e   : > { %v2817_v6 = vand.u32 4294901760, %v13341_v5 }
 0x220   : > { %v2818_v7 = vsub.f32 %v13341_v5, %v2817_v6  ;;  %v13352_v10 = vpop.permute.xlu1 %934 }
 0x222   : > { %v2819_v8 = vand.u32 4294901760, %v2818_v7  ;;  %v13402_v7 = vand.u32 4294901760, %v2246_v3 }
 0x224   : > { %11592 = vmatprep.mubr.f32.mxu0 %v2819_v8  ;;  %v13406_v8 = vsub.f32 %v2246_v3, %v13402_v7 }
 0x22b   : > { %996 = vxpose.xlu0.b32.start [1/2] (short) (narrow) %v949_v1, 8 }
 0x22f   : > { %997 = vxpose.xlu0.b32.end [2/2] (short) (narrow) %v951_v57, 8 }
 0x258   : > { %944 = vrot.lane.b32.xlu0 %v13276_v48, %s12955_s20 }
 0x25c   : > { %964 = vrot.lane.b32.xlu0 %v13348_v9, %s12948_s19 }
 0x260   : > { %968 = vrot.lane.b32.xlu0 %v13352_v10, %s12948_s19 }
 0x264   : > { %966 = vrot.lane.b32.xlu0 %v13318_v61, %s12948_s19 }
 0x268   : > { %970 = vrot.lane.b32.xlu0 %v13326_v63, %s12948_s19 }
 0x26c   : > { %972 = vrot.lane.b32.xlu0 %v13360_v11, %s12948_s19 }
 0x277   : > { %v955_v14 = vpop.permute.xlu1 %954 }
 0x27b   : > { %v13372_v28 = vpop.permute.xlu1 %958 }
 0x27f   : > { %v953_v13 = vpop.permute.xlu0 %952  ;;  %v963_v29 = vpop.permute.xlu1 %962 }
 0x280   : > { %1028 = vxpose.xlu1.b32.start [1/2] (short) (narrow) %v953_v13, 8  ;;  %v2321_v13 = vand.u32 4294901760, %v13406_v8 }
 0x283   : > { %v13379_v31 = vpop.permute.xlu1 %956 }
 0x284   : > { %1029 = vxpose.xlu1.b32.end [2/2] (short) (narrow) %v955_v14, 8  ;;  %v2322_v14 = vsub.f32 %v13406_v8, %v2321_v13 }
 0x286   : > { %v2323_v15 = vand.u32 4294901760, %v2322_v14 }
 0x28b   : > { %v961_v33 = vpop.permute.xlu1 %960 }
 0x2a2   : > { %940 = vrot.lane.b32.xlu1 %v13276_v48, %s12954_s25 }
 0x2ab   : > { %v1012_v19 = vpop.trf.xlu0 }
 0x2ac   : > { %v1259_v21 = vsel %vm1257_vm2, %v1012_v19, 0 }
 0x2ad   : > { %v1262_v22 = vand.u32 4294901760, %v1259_v21 }
 0x2af   : > { %v1349_v23 = vsub.f32 %v1259_v21, %v1262_v22  ;;  %11500 = vmatprep.subr.mxu1 %v1262_v22 }
 0x2b0   : > { %11501 = vmatpush3.msra.mxu1 %v1262_v22 }
 0x2b1   : > { %11503 = vmatmul.mubr.f32.vlgmr.msra.gmra.mrb[0].mxu1 %v1341_v24  ;;  %v1350_v25 = vand.u32 4294901760, %v1349_v23 }
 0x2b2   : > { %11507 = vmatprep.mubr.f32.mxu1 %v13285_v52 }
 0x2b3   : > { %v1351_v26 = vsub.f32 %v1349_v23, %v1350_v25 }
 0x2b5   : > { %v1352_v27 = vand.u32 4294901760, %v1351_v26 }
 0x2b7   : > { %11505 = vmatprep.subr.mxu1 %v1352_v27 }
 0x2b8   : > { %11506 = vmatpush3.msra.mxu1 %v1352_v27  ;;  %v3734_v27 = vsel %vm1252_vm1, %v13352_v10, 0 }
 0x2b9   : > { %11508 = vmatmul.mubr.f32.vlgmr.msra.gmra.mrb[0].mxu1 %v1337_v16  ;;  %11510 = vmatprep.subr.mxu1 %v1349_v23 }
 0x2ba   : > { %11512 = vmatprep.mubr.f32.mxu1 %v13290_v53  ;;  %11511 = vmatpush3.msra.mxu1 %v1349_v23 }
 0x2bb   : > { %11515 = vmatprep.subr.mxu1 %v1262_v22 }
 0x2c1   : > { %11513 = vmatmul.mubr.f32.vlgmr.msra.gmra.mrb[0].mxu1 %v1338_v17 }
 0x2c2   : > { %11517 = vmatprep.mubr.f32.mxu1 %v1329_v54  ;;  %11516 = vmatpush3.msra.mxu1 %v1262_v22 }
 0x2c3   : > { %11520 = vmatprep.subr.mxu1 %v1350_v25 }
 0x2c9   : > { %11518 = vmatmul.mubr.f32.vlgmr.msra.gmra.mrb[0].mxu1 %v1339_v18 }
 0x2ca   : > { %11522 = vmatprep.mubr.f32.mxu1 %v13285_v52  ;;  %11521 = vmatpush3.msra.mxu1 %v1350_v25  ;;  %v13390_v44 = vpop.permute.xlu0 %944 }
 0x2cb   : > { %1092 = vxpose.xlu1.b32.start [1/2] (short) (narrow) %v961_v33, 8  ;;  %11525 = vmatprep.subr.mxu1 %v1262_v22 }
 0x2cf   : > { %1093 = vxpose.xlu1.b32.end [2/2] (short) (narrow) %v963_v29, 8 }
 0x2d1   : > { %11523 = vmatmul.mubr.f32.vlgmr.msra.gmra.mrb[0].mxu1 %v1337_v16 }
 0x2d2   : > { %11527 = vmatprep.mubr.f32.mxu1 %v13285_v52  ;;  %11526 = vmatpush3.msra.mxu1 %v1262_v22  ;;  %v965_v52 = vpop.permute.xlu0 %964 }
 0x2d6   : > { %v969_v55 = vpop.permute.xlu0 %968 }
 0x2d9   : > { %11528 = vmatmul.mubr.f32.vlgmr.msra.gmra.mrb[0].mxu1 %v1337_v16  ;;  %v2744_v16 = vsel %vm1252_vm1, %v13312_v59, 0 }
 0x2da   : > { %11532 = vmatprep.mubr.f32.mxu1 %v1827_v37  ;;  %v967_v56 = vpop.permute.xlu0 %966  ;;  %v2825_v17 = vand.u32 4294901760, %v2744_v16 }
 0x2dc   : > { %v2826_v18 = vsub.f32 %v2744_v16, %v2825_v17 }
 0x2de   : > { %v971_v1 = vpop.permute.xlu0 %970  ;;  %v2827_v19 = vand.u32 4294901760, %v2826_v18 }
 0x2e0   : > { %v2828_v20 = vsub.f32 %v2826_v18, %v2827_v19 }
 0x2e2   : > { %v2829_v24 = vand.u32 4294901760, %v2828_v20 }
 0x2ed   : > { %976 = vrot.lane.b32.xlu1 %v13364_v12, %s12948_s19 }
 0x300   : > { %v1044_v42 = vpop.trf.xlu1 }
 0x301   : > { %v1755_v45 = vsel %vm1257_vm2, %v1044_v42, 0 }
 0x302   : > { %v1758_v46 = vand.u32 4294901760, %v1755_v45 }
 0x304   : > { %v1845_v47 = vsub.f32 %v1755_v45, %v1758_v46  ;;  %11530 = vmatprep.subr.mxu1 %v1758_v46 }
 0x305   : > { %11531 = vmatpush3.msra.mxu1 %v1758_v46 }
 0x306   : > { %11533 = vmatmul.mubr.f32.vlgmr.msra.gmra.mrb[2].mxu1 %v1837_v49  ;;  %v1846_v51 = vand.u32 4294901760, %v1845_v47 }
 0x307   : > { %11537 = vmatprep.mubr.f32.mxu1 %v13381_v32 }
 0x308   : > { %v1847_v53 = vsub.f32 %v1845_v47, %v1846_v51 }
 0x30a   : > { %v1848_v54 = vand.u32 4294901760, %v1847_v53 }
 0x30c   : > { %11535 = vmatprep.subr.mxu1 %v1848_v54 }
 0x30d   : > { %11536 = vmatpush3.msra.mxu1 %v1848_v54 }
 0x30e   : > { %11538 = vmatmul.mubr.f32.vlgmr.msra.gmra.mrb[2].mxu1 %v1833_v39  ;;  %11540 = vmatprep.subr.mxu1 %v1845_v47 }
 0x30f   : > { %11542 = vmatprep.mubr.f32.mxu1 %v1824_v34  ;;  %11541 = vmatpush3.msra.mxu1 %v1845_v47 }
 0x310   : > { %11545 = vmatprep.subr.mxu1 %v1758_v46 }
 0x314   : > { %v13394_v57 = vpop.permute.xlu1 %940 }
 0x315   : > { %974 = vrot.lane.b32.xlu0 %v13394_v57, %s12948_s19 }
 0x316   : > { %1156 = vxpose.xlu1.b32.start [1/2] (short) (narrow) %v969_v55, 8  ;;  %11543 = vmatmul.mubr.f32.vlgmr.msra.gmra.mrb[2].mxu1 %v1834_v40 }
 0x317   : > { %11546 = vmatpush3.msra.mxu1 %v1758_v46  ;;  %11547 = vmatprep.mubr.f32.mxu1 %v1825_v35  ;;  %v973_v35 = vpop.permute.xlu0 %972 }
 0x318   : > { %11550 = vmatprep.subr.mxu1 %v1846_v51 }
 0x319   : > { %978 = vrot.lane.b32.xlu0 %v13390_v44, %s12948_s19  ;;  %s12965_s19 = smov 16  }
 0x31a   : > { %1157 = vxpose.xlu1.b32.end [2/2] (short) (narrow) %v971_v1, 8 }
 0x31e   : > { %11548 = vmatmul.mubr.f32.vlgmr.msra.gmra.mrb[2].mxu1 %v1835_v41 }
 0x31f   : > { %11551 = vmatpush3.msra.mxu1 %v1846_v51  ;;  %11552 = vmatprep.mubr.f32.mxu1 %v13381_v32 }
 0x320   : > { %11555 = vmatprep.subr.mxu1 %v1758_v46 }
 0x326   : > { %11553 = vmatmul.mubr.f32.vlgmr.msra.gmra.mrb[2].mxu1 %v1833_v39 }
 0x327   : > { %11556 = vmatpush3.msra.mxu1 %v1758_v46  ;;  %11557 = vmatprep.mubr.f32.mxu1 %v13381_v32  ;;  %v13457_v46 = vand.u32 4294901760, %v2248_v43 }
 0x329   : > { %v2330_v51 = vsub.f32 %v2248_v43, %v13457_v46 }
 0x32b   : > { %v2331_v53 = vand.u32 4294901760, %v2330_v51 }
 0x32d   : > { %v2332_v55 = vsub.f32 %v2330_v51, %v2331_v53 }
 0x32e   : > { %11558 = vmatmul.mubr.f32.vlgmr.msra.gmra.mrb[2].mxu1 %v1833_v39 }
 0x32f   : > { %11562 = vmatprep.mubr.f32.mxu1 %v2323_v15  ;;  %v2333_v15 = vand.u32 4294901760, %v2332_v55 }
 0x337   : > { %1060 = vxpose.xlu0.b32.start [1/2] (short) (narrow) %v13379_v31, 8 }
 0x338   : > { %5399 = vrot.lane.b32.xlu1 %v13278_v50, %s12956_s14 }
 0x33b   : > { %1061 = vxpose.xlu0.b32.end [2/2] (short) (narrow) %v13372_v28, 8  ;;  %v13432_v28 = vand.u32 4294901760, %v3734_v27 }
 0x33c   : > { %5403 = vrot.lane.b32.xlu1 %v13320_v62, %s12956_s14 }
 0x33d   : > { %v3808_v29 = vsub.f32 %v3734_v27, %v13432_v28 }
 0x33f   : > { %1124 = vxpose.xlu0.b32.start [1/2] (short) (narrow) %v965_v52, 8  ;;  %v4726_v52 = vsel %vm1252_vm1, %v13364_v12, 0 }
 0x340   : > { %5415 = vrot.lane.b32.xlu1 %v13348_v9, %s12956_s14  ;;  %v13466_v54 = vand.u32 4294901760, %v4726_v52 }
 0x343   : > { %1125 = vxpose.xlu0.b32.end [2/2] (short) (narrow) %v967_v56, 8  ;;  %v13470_v56 = vsub.f32 %v4726_v52, %v13466_v54 }
 0x344   : > { %5417 = vrot.lane.b32.xlu1 %v13318_v61, %s12956_s14 }
 0x345   : > { %v4801_v16 = vand.u32 4294901760, %v13470_v56 }
 0x34b   : > { %v1108_v50 = vpop.trf.xlu1 }
 0x34c   : > { %v2747_v21 = vsel %vm1257_vm2, %v1108_v50, 0 }
 0x34d   : > { %v2750_v22 = vand.u32 4294901760, %v2747_v21 }
 0x34f   : > { %v2837_v23 = vsub.f32 %v2747_v21, %v2750_v22  ;;  %11590 = vmatprep.subr.mxu0 %v2750_v22 }
 0x350   : > { %11591 = vmatpush3.msra.mxu0 %v2750_v22 }
 0x351   : > { %11593 = vmatmul.mubr.f32.vlgmr.msra.gmra.mrb[2].mxu0 %v2829_v24  ;;  %v2838_v62 = vand.u32 4294901760, %v2837_v23 }
 0x352   : > { %11597 = vmatprep.mubr.f32.mxu0 %v13338_v4 }
 0x353   : > { %v2839_v25 = vsub.f32 %v2837_v23, %v2838_v62 }
 0x355   : > { %v2840_v26 = vand.u32 4294901760, %v2839_v25 }
 0x357   : > { %11595 = vmatprep.subr.mxu0 %v2840_v26 }
 0x358   : > { %11596 = vmatpush3.msra.mxu0 %v2840_v26 }
 0x359   : > { %11598 = vmatmul.mubr.f32.vlgmr.msra.gmra.mrb[2].mxu0 %v2825_v17  ;;  %11600 = vmatprep.subr.mxu0 %v2837_v23 }
 0x35a   : > { %11602 = vmatprep.mubr.f32.mxu0 %v13341_v5  ;;  %11601 = vmatpush3.msra.mxu0 %v2837_v23  ;;  %v3809_v5 = vand.u32 4294901760, %v3808_v29  ;;  %v3238_v23 = vsel %vm1252_vm1, %v13348_v9, 0 }
 0x35b   : > { %11605 = vmatprep.subr.mxu0 %v2750_v22  ;;  %v3311_v25 = vand.u32 4294901760, %v3238_v23 }
 0x35f   : > { %v977_v32 = vpop.permute.xlu1 %976 }
 0x361   : > { %11603 = vmatmul.mubr.f32.vlgmr.msra.gmra.mrb[2].mxu0 %v2826_v18 }
 0x362   : > { %11607 = vmatprep.mubr.f32.mxu0 %v2817_v6  ;;  %11606 = vmatpush3.msra.mxu0 %v2750_v22  ;;  %v3810_v6 = vsub.f32 %v3808_v29, %v3809_v5 }
 0x363   : > { %11610 = vmatprep.subr.mxu0 %v2838_v62 }
 0x364   : > { %v3811_v30 = vand.u32 4294901760, %v3810_v6 }
 0x369   : > { %11608 = vmatmul.mubr.f32.vlgmr.msra.gmra.mrb[2].mxu0 %v2827_v19  ;;  %v4802_v19 = vsub.f32 %v13470_v56, %v4801_v16 }
 0x36a   : > { %11612 = vmatprep.mubr.f32.mxu0 %v13338_v4  ;;  %11611 = vmatpush3.msra.mxu0 %v2838_v62  ;;  %v3240_v62 = vsel %vm1252_vm1, %v13318_v61, 0 }
 0x36b   : > { %11615 = vmatprep.subr.mxu0 %v2750_v22  ;;  %v4803_v20 = vand.u32 4294901760, %v4802_v19 }
 0x36c   : > { %5401 = vrot.lane.b32.xlu0 %v13276_v48, %s12956_s14  ;;  %v3736_v48 = vsel %vm1252_vm1, %v13326_v63, 0 }
 0x370   : > { %5405 = vrot.lane.b32.xlu0 %v13308_v58, %s12956_s14  ;;  %v13449_v58 = vand.u32 4294901760, %v3736_v48 }
 0x371   : > { %11613 = vmatmul.mubr.f32.vlgmr.msra.gmra.mrb[2].mxu0 %v2825_v17 }
 0x372   : > { %11617 = vmatprep.mubr.f32.mxu0 %v13338_v4  ;;  %11616 = vmatpush3.msra.mxu0 %v2750_v22  ;;  %v3818_v4 = vsub.f32 %v3736_v48, %v13449_v58 }
 0x374   : > { %5407 = vrot.lane.b32.xlu0 %v13328_v0, %s12956_s14  ;;  %v3819_v31 = vand.u32 4294901760, %v3818_v4 }
 0x376   : > { %v3820_v33 = vsub.f32 %v3818_v4, %v3819_v31 }
 0x378   : > { %5411 = vrot.lane.b32.xlu0 %v13332_v2, %s12956_s14  ;;  %v3821_v37 = vand.u32 4294901760, %v3820_v33  ;;  %v4230_v33 = vsel %vm1252_vm1, %v13360_v11, 0 }
 0x379   : > { %11618 = vmatmul.mubr.f32.vlgmr.msra.gmra.mrb[2].mxu0 %v2825_v17 }
 0x37a   : > { %11652 = vmatprep.mubr.f32.mxu0 %v3811_v30 }
 0x37c   : > { %5409 = vrot.lane.b32.xlu0 %v13314_v60, %s12956_s14 }
 0x387   : > { %v975_v39 = vpop.permute.xlu0 %974 }
 0x38b   : > { %v979_v42 = vpop.permute.xlu0 %978 }
 0x396   : > { %v1172_v0 = vpop.trf.xlu1 }
 0x397   : > { %v3739_v34 = vsel %vm1257_vm2, %v1172_v0, 0 }
 0x398   : > { %v3742_v2 = vand.u32 4294901760, %v3739_v34 }
 0x39a   : > { %v3829_v36 = vsub.f32 %v3739_v34, %v3742_v2  ;;  %11650 = vmatprep.subr.mxu0 %v3742_v2  ;;  %1188 = vxpose.xlu0.b32.start [1/2] (short) (narrow) %v973_v35, 8  ;;  %v13504_v34 = vand.u32 4294901760, %v4230_v33 }
 0x39b   : > { %11651 = vmatpush3.msra.mxu0 %v3742_v2 }
 0x39c   : > { %11653 = vmatmul.mubr.f32.vlgmr.msra.gmra.mrb[4].mxu0 %v3821_v37  ;;  %v3830_v38 = vand.u32 4294901760, %v3829_v36 }
 0x39d   : > { %11657 = vmatprep.mubr.f32.mxu0 %v13432_v28 }
 0x39e   : > { %1189 = vxpose.xlu0.b32.end [2/2] (short) (narrow) %v975_v39, 8  ;;  %v3831_v40 = vsub.f32 %v3829_v36, %v3830_v38 }
 0x3a0   : > { %v3832_v41 = vand.u32 4294901760, %v3831_v40 }
 0x3a2   : > { %11655 = vmatprep.subr.mxu0 %v3832_v41  ;;  %1220 = vxpose.xlu0.b32.start [1/2] (short) (narrow) %v977_v32, 8 }
 0x3a3   : > { %11656 = vmatpush3.msra.mxu0 %v3832_v41  ;;  %v13518_v41 = vld [vmem:[#allocation5] sm:$0xff] }
 0x3a4   : > { %11658 = vmatmul.mubr.f32.vlgmr.msra.gmra.mrb[4].mxu0 %v13449_v58  ;;  %11660 = vmatprep.subr.mxu0 %v3829_v36 }
 0x3a5   : > { %11662 = vmatprep.mubr.f32.mxu0 %v3808_v29  ;;  %11661 = vmatpush3.msra.mxu0 %v3829_v36  ;;  %v13507_v36 = vsub.f32 %v4230_v33, %v13504_v34 }
 0x3a6   : > { %1221 = vxpose.xlu0.b32.end [2/2] (short) (narrow) %v979_v42, 8  ;;  %11665 = vmatprep.subr.mxu0 %v3742_v2 }
 0x3a7   : > { %v4305_v37 = vand.u32 4294901760, %v13507_v36 }
 0x3a9   : > { %v4306_v39 = vsub.f32 %v13507_v36, %v4305_v37 }
 0x3aa   : > { %v5400_v45 = vpop.permute.xlu1 %5399 }
 0x3ab   : > { %5447 = vxpose.xlu1.b32.start [1/2] (short) (narrow) %v5400_v45, 8  ;;  %v4307_v42 = vand.u32 4294901760, %v4306_v39 }
 0x3ac   : > { %v13459_v47 = vpop.f32.mrb[0].mxu1  ;;  %11663 = vmatmul.mubr.f32.vlgmr.msra.gmra.mrb[4].mxu0 %v3818_v4 }
 0x3ad   : > { %v13461_v49 = vpop.f32.mrb[1].mxu1  ;;  %11667 = vmatprep.mubr.f32.mxu0 %v3809_v5  ;;  %11666 = vmatpush3.msra.mxu0 %v3742_v2 }
 0x3ae   : > { %11670 = vmatprep.subr.mxu0 %v3830_v38  ;;  %v13522_v43 = vadd.f32 %v13461_v49, %v13518_v41 }
 0x3b4   : > { %11668 = vmatmul.mubr.f32.vlgmr.msra.gmra.mrb[4].mxu0 %v3819_v31 }
 0x3b5   : > { %11672 = vmatprep.mubr.f32.mxu0 %v13432_v28  ;;  %11671 = vmatpush3.msra.mxu0 %v3830_v38  ;;  %v4232_v38 = vsel %vm1252_vm1, %v13394_v57, 0 }
 0x3b6   : > { %11675 = vmatprep.subr.mxu0 %v3742_v2  ;;  %v13516_v40 = vand.u32 4294901760, %v4232_v38 }
 0x3b7   : > { %v1076_v60 = vpop.trf.xlu0 }
 0x3b8   : > { %v2251_v1 = vsel %vm1257_vm2, %v1076_v60, 0  ;;  %v13526_v45 = vsub.f32 %v4232_v38, %v13516_v40 }
 0x3b9   : > { %v2254_v3 = vand.u32 4294901760, %v2251_v1 }
 0x3ba   : > { %v4315_v60 = vand.u32 4294901760, %v13526_v45 }
 0x3bb   : > { %v2341_v14 = vsub.f32 %v2251_v1, %v2254_v3  ;;  %11560 = vmatprep.subr.mxu1 %v2254_v3 }
 0x3bc   : > { %11561 = vmatpush3.msra.mxu1 %v2254_v3  ;;  %11673 = vmatmul.mubr.f32.vlgmr.msra.gmra.mrb[4].mxu0 %v13449_v58 }
 0x3bd   : > { %11563 = vmatmul.mubr.f32.vlgmr.msra.gmra.mrb[4].mxu1 %v2333_v15  ;;  %11677 = vmatprep.mubr.f32.mxu0 %v13432_v28  ;;  %v2342_v17 = vand.u32 4294901760, %v2341_v14 }
 0x3be   : > { %11567 = vmatprep.mubr.f32.mxu1 %v13402_v7  ;;  %11676 = vmatpush3.msra.mxu0 %v3742_v2 }
 0x3bf   : > { %v2343_v18 = vsub.f32 %v2341_v14, %v2342_v17  ;;  %v1140_v21 = vpop.trf.xlu0 }
 0x3c0   : > { %v3243_v22 = vsel %vm1257_vm2, %v1140_v21, 0 }
 0x3c1   : > { %v2344_v50 = vand.u32 4294901760, %v2343_v18  ;;  %v3246_v24 = vand.u32 4294901760, %v3243_v22 }
 0x3c3   : > { %11565 = vmatprep.subr.mxu1 %v2344_v50 }
 0x3c4   : > { %11566 = vmatpush3.msra.mxu1 %v2344_v50  ;;  %11678 = vmatmul.mubr.f32.vlgmr.msra.gmra.mrb[4].mxu0 %v13449_v58 }
 0x3c5   : > { %11568 = vmatmul.mubr.f32.vlgmr.msra.gmra.mrb[4].mxu1 %v13457_v46  ;;  %11570 = vmatprep.subr.mxu1 %v2341_v14 }
 0x3c6   : > { %11712 = vmatprep.mubr.f32.mxu0 %v4803_v20  ;;  %11571 = vmatpush3.msra.mxu1 %v2341_v14 }
 0x3c7   : > { %11572 = vmatprep.mubr.f32.mxu1 %v13406_v8  ;;  %11575 = vmatprep.subr.mxu1 %v2254_v3  ;;  %v13493_v8 = vand.u32 4294901760, %v3240_v62 }
 0x3c9   : > { %v3322_v26 = vsub.f32 %v3240_v62, %v13493_v8 }
 0x3cb   : > { %v3323_v61 = vand.u32 4294901760, %v3322_v26 }
 0x3cd   : > { %11573 = vmatmul.mubr.f32.vlgmr.msra.gmra.mrb[4].mxu1 %v2330_v51  ;;  %v3324_v30 = vsub.f32 %v3322_v26, %v3323_v61  ;;  %v13530_v51 = vld [vmem:[#allocation5 + $0x8] sm:$0xff] }
 0x3ce   : > { %11576 = vmatpush3.msra.mxu1 %v2254_v3  ;;  %11577 = vmatprep.mubr.f32.mxu1 %v2321_v13  ;;  %v3333_v13 = vsub.f32 %v3243_v22, %v3246_v24  ;;  %v13542_v55 = vadd.f32 %v13459_v47, %v13530_v51 }
 0x3cf   : > { %11580 = vmatprep.subr.mxu1 %v2342_v17  ;;  %5413 = vrot.lane.b32.xlu0 %v13312_v59, %s12956_s14  ;;  %v3312_v59 = vsub.f32 %v3238_v23, %v3311_v25  ;;  %v3325_v31 = vand.u32 4294901760, %v3324_v30 }
 0x3d0   : > { %v3334_v27 = vand.u32 4294901760, %v3333_v13  ;;  %v5226_v50 = vsel %vm5222_vm3, %v13542_v55, -inf }
 0x3d1   : > { %v3313_v28 = vand.u32 4294901760, %v3312_v59 }
 0x3d2   : > { %v3335_v29 = vsub.f32 %v3333_v13, %v3334_v27 }
 0x3d3   : > { %v3314_v5 = vsub.f32 %v3312_v59, %v3313_v28 }
 0x3d4   : > { %v3336_v48 = vand.u32 4294901760, %v3335_v29 }
 0x3d5   : > { %11578 = vmatmul.mubr.f32.vlgmr.msra.gmra.mrb[4].mxu1 %v2331_v53  ;;  %v3315_v58 = vand.u32 4294901760, %v3314_v5  ;;  %v5223_v53 = vsel %vm5222_vm3, %v13522_v43, -inf }
 0x3d6   : > { %11581 = vmatpush3.msra.mxu1 %v2342_v17  ;;  %11582 = vmatprep.mubr.f32.mxu1 %v13402_v7  ;;  %v4316_v17 = vsub.f32 %v13526_v45, %v4315_v60 }
 0x3d7   : > { %11585 = vmatprep.subr.mxu1 %v2254_v3 }
 0x3d8   : > { %v4317_v21 = vand.u32 4294901760, %v4316_v17  ;;  %v12959_v17 = vmov 0.0  }
 0x3dd   : > { %11583 = vmatmul.mubr.f32.vlgmr.msra.gmra.mrb[4].mxu1 %v13457_v46 }
 0x3de   : > { %11586 = vmatpush3.msra.mxu1 %v2254_v3  ;;  %v5402_v9 = vpop.permute.xlu0 %5401  ;;  %11587 = vmatprep.mubr.f32.mxu1 %v13402_v7  ;;  %v5404_v7 = vpop.permute.xlu1 %5403 }
 0x3df   : > { %5448 = vxpose.xlu1.b32.end [2/2] (short) (narrow) %v5402_v9, 8  ;;  %11620 = vmatprep.subr.mxu1 %v3246_v24 }
 0x3e2   : > { %v5406_v6 = vpop.permute.xlu0 %5405 }
 0x3e5   : > { %11588 = vmatmul.mubr.f32.vlgmr.msra.gmra.mrb[4].mxu1 %v13457_v46  ;;  %v4728_v46 = vsel %vm1252_vm1, %v13390_v44, 0 }
 0x3e6   : > { %v5408_v4 = vpop.permute.xlu0 %5407  ;;  %11622 = vmatprep.mubr.f32.mxu1 %v3315_v58  ;;  %11621 = vmatpush3.msra.mxu1 %v3246_v24  ;;  %v13537_v49 = vand.u32 4294901760, %v4728_v46 }
 0x3e7   : > { %5511 = vxpose.xlu1.b32.start [1/2] (short) (narrow) %v5408_v4, 8  ;;  %11625 = vmatprep.subr.mxu1 %v3336_v48 }
 0x3e8   : > { %v4810_v3 = vsub.f32 %v4728_v46, %v13537_v49 }
 0x3e9   : > { %11623 = vmatmul.mubr.f32.vlgmr.msra.gmra.mrb[6].mxu1 %v3325_v31 }
 0x3ea   : > { %v13499_v32 = vpop.permute.xlu0 %5411  ;;  %11627 = vmatprep.mubr.f32.mxu1 %v3311_v25  ;;  %11626 = vmatpush3.msra.mxu1 %v3336_v48  ;;  %v4811_v22 = vand.u32 4294901760, %v4810_v3  ;;  %v13586_v48 = vpop.permute.xlu1 %5415 }
 0x3eb   : > { %11630 = vmatprep.subr.mxu1 %v3333_v13 }
 0x3ed   : > { %5479 = vxpose.xlu0.b32.start [1/2] (short) (narrow) %v5404_v7, 8 }
 0x3ee   : > { %v5410_v0 = vpop.permute.xlu0 %5409 }
 0x3ef   : > { %5512 = vxpose.xlu1.b32.end [2/2] (short) (narrow) %v5410_v0, 8 }
 0x3f1   : > { %5480 = vxpose.xlu0.b32.end [2/2] (short) (narrow) %v5406_v6, 8  ;;  %11628 = vmatmul.mubr.f32.vlgmr.msra.gmra.mrb[6].mxu1 %v13493_v8 }
 0x3f2   : > { %11631 = vmatpush3.msra.mxu1 %v3333_v13  ;;  %11632 = vmatprep.mubr.f32.mxu1 %v3312_v59 }
 0x3f3   : > { %11635 = vmatprep.subr.mxu1 %v3246_v24 }
 0x3f9   : > { %11633 = vmatmul.mubr.f32.vlgmr.msra.gmra.mrb[6].mxu1 %v3322_v26 }
 0x3fa   : > { %11636 = vmatpush3.msra.mxu1 %v3246_v24  ;;  %11637 = vmatprep.mubr.f32.mxu1 %v3313_v28 }
 0x3fb   : > { %11640 = vmatprep.subr.mxu1 %v3334_v27 }
 0x401   : > { %v11559_v2 = vpop.f32.mrb[2].mxu1  ;;  %11638 = vmatmul.mubr.f32.vlgmr.msra.gmra.mrb[6].mxu1 %v3323_v61 }
 0x402   : > { %11641 = vmatpush3.msra.mxu1 %v3334_v27  ;;  %v2236_v35 = vpop.f32.mrb[3].mxu1  ;;  %11642 = vmatprep.mubr.f32.mxu1 %v3311_v25  ;;  %v13533_v52 = vadd.f32 %v11559_v2, %v13530_v51 }
 0x403   : > { %11645 = vmatprep.subr.mxu1 %v3246_v24  ;;  %v13548_v14 = vadd.f32 %v2236_v35, %v13518_v41 }
 0x404   : > { %v5232_v1 = vsel %vm5222_vm3, %v13533_v52, -inf }
 0x405   : > { %v5229_v20 = vsel %vm5222_vm3, %v13548_v14, -inf }
 0x409   : > { %11643 = vmatmul.mubr.f32.vlgmr.msra.gmra.mrb[6].mxu1 %v13493_v8 }
 0x40a   : > { %11646 = vmatpush3.msra.mxu1 %v3246_v24  ;;  %11647 = vmatprep.mubr.f32.mxu1 %v3311_v25  ;;  %v4812_v25 = vsub.f32 %v4810_v3, %v4811_v22 }
 0x40c   : > { %v4813_v27 = vand.u32 4294901760, %v4812_v25 }
 0x411   : > { %11648 = vmatmul.mubr.f32.vlgmr.msra.gmra.mrb[6].mxu1 %v13493_v8 }
 0x412   : > { %11682 = vmatprep.mubr.f32.mxu1 %v4307_v42 }
 0x416   : > { %5224 = vmax.xlane.f32.xlu1 %v5223_v53 }
 0x41a   : > { %v1204_v15 = vpop.trf.xlu0  ;;  %5233 = vmax.xlane.f32.xlu1 %v5232_v1 }
 0x41b   : > { %v4235_v18 = vsel %vm1257_vm2, %v1204_v15, 0  ;;  %v12957_v15 = vmov 0.0|0.0  }
 0x41c   : > { %v4238_v19 = vand.u32 4294901760, %v4235_v18 }
 0x41e   : > { %v4325_v47 = vsub.f32 %v4235_v18, %v4238_v19  ;;  %11680 = vmatprep.subr.mxu1 %v4238_v19  ;;  %5227 = vmax.xlane.f32.xlu0 %v5226_v50 }
 0x41f   : > { %5230 = vmax.xlane.f32.xlu1 %v5229_v20  ;;  %11681 = vmatpush3.msra.mxu1 %v4238_v19 }
 0x420   : > { %11683 = vmatmul.mubr.f32.vlgmr.msra.gmra.mrb[8].mxu1 %v4317_v21  ;;  %v4326_v23 = vand.u32 4294901760, %v4325_v47 }
 0x421   : > { %11687 = vmatprep.mubr.f32.mxu1 %v13504_v34 }
 0x422   : > { %v1236_v24 = vpop.trf.xlu0  ;;  %v4327_v62 = vsub.f32 %v4325_v47, %v4326_v23 }
 0x423   : > { %v4731_v8 = vsel %vm1257_vm2, %v1236_v24, 0 }
 0x424   : > { %v4734_v13 = vand.u32 4294901760, %v4731_v8  ;;  %v4328_v59 = vand.u32 4294901760, %v4327_v62 }
 0x426   : > { %v4821_v26 = vsub.f32 %v4731_v8, %v4734_v13  ;;  %11685 = vmatprep.subr.mxu1 %v4328_v59  ;;  %11710 = vmatprep.subr.mxu0 %v4734_v13 }
 0x427   : > { %11686 = vmatpush3.msra.mxu1 %v4328_v59  ;;  %11711 = vmatpush3.msra.mxu0 %v4734_v13 }
 0x428   : > { %11688 = vmatmul.mubr.f32.vlgmr.msra.gmra.mrb[8].mxu1 %v13516_v40  ;;  %11713 = vmatmul.mubr.f32.vlgmr.msra.gmra.mrb[6].mxu0 %v4813_v27  ;;  %v4822_v28 = vand.u32 4294901760, %v4821_v26 }
 0x429   : > { %11692 = vmatprep.mubr.f32.mxu1 %v13507_v36  ;;  %11717 = vmatprep.mubr.f32.mxu0 %v13466_v54 }
 0x42a   : > { %11690 = vmatprep.subr.mxu1 %v4325_v47  ;;  %v4823_v9 = vsub.f32 %v4821_v26, %v4822_v28 }
 0x42b   : > { %11691 = vmatpush3.msra.mxu1 %v4325_v47 }
 0x42c   : > { %v4824_v61 = vand.u32 4294901760, %v4823_v9  ;;  %11695 = vmatprep.subr.mxu1 %v4238_v19 }
 0x42e   : > { %11715 = vmatprep.subr.mxu0 %v4824_v61 }
 0x42f   : > { %11716 = vmatpush3.msra.mxu0 %v4824_v61 }
 0x430   : > { %11693 = vmatmul.mubr.f32.vlgmr.msra.gmra.mrb[8].mxu1 %v13526_v45  ;;  %11718 = vmatmul.mubr.f32.vlgmr.msra.gmra.mrb[6].mxu0 %v13537_v49 }
 0x431   : > { %11697 = vmatprep.mubr.f32.mxu1 %v4305_v37  ;;  %11722 = vmatprep.mubr.f32.mxu0 %v13470_v56 }
 0x432   : > { %11720 = vmatprep.subr.mxu0 %v4821_v26  ;;  %11696 = vmatpush3.msra.mxu1 %v4238_v19 }
 0x433   : > { %11721 = vmatpush3.msra.mxu0 %v4821_v26  ;;  %11700 = vmatprep.subr.mxu1 %v4326_v23 }
 0x434   : > { %11725 = vmatprep.subr.mxu0 %v4734_v13 }
 0x438   : > { %11698 = vmatmul.mubr.f32.vlgmr.msra.gmra.mrb[8].mxu1 %v4315_v60  ;;  %11723 = vmatmul.mubr.f32.vlgmr.msra.gmra.mrb[6].mxu0 %v4810_v3 }
 0x439   : > { %11702 = vmatprep.mubr.f32.mxu1 %v13504_v34  ;;  %11727 = vmatprep.mubr.f32.mxu0 %v4801_v16 }
 0x43a   : > { %11701 = vmatpush3.msra.mxu1 %v4326_v23  ;;  %11726 = vmatpush3.msra.mxu0 %v4734_v13 }
 0x43b   : > { %11705 = vmatprep.subr.mxu1 %v4238_v19  ;;  %11730 = vmatprep.subr.mxu0 %v4822_v28 }
 0x440   : > { %11703 = vmatmul.mubr.f32.vlgmr.msra.gmra.mrb[8].mxu1 %v13516_v40  ;;  %11728 = vmatmul.mubr.f32.vlgmr.msra.gmra.mrb[6].mxu0 %v4811_v22 }
 0x441   : > { %11706 = vmatpush3.msra.mxu1 %v4238_v19  ;;  %11731 = vmatpush3.msra.mxu0 %v4822_v28  ;;  %v5414_v0 = vpop.permute.xlu0 %5413 }
 0x442   : > { %11732 = vmatprep.mubr.f32.mxu0 %v13466_v54  ;;  %11735 = vmatprep.subr.mxu0 %v4734_v13 }
 0x443   : > { %11707 = vmatprep.mubr.f32.mxu1 %v13504_v34  ;;  %12199 = vmatprep.subr.bf16.mxu1 %v12957_v15 }
 0x448   : > { %11708 = vmatmul.mubr.f32.vlgmr.msra.gmra.mrb[8].mxu1 %v13516_v40  ;;  %11733 = vmatmul.mubr.f32.vlgmr.msra.gmra.mrb[6].mxu0 %v13537_v49 }
 0x449   : > { %11736 = vmatpush3.msra.mxu0 %v4734_v13  ;;  %11737 = vmatprep.mubr.f32.mxu0 %v13466_v54  ;;  %v13588_v54 = vpop.permute.xlu1 %5417 }
 0x44a   : > { %12190 = vmatprep.subr.bf16.mxu0 %v12957_v15  ;;  %11765 = vmatprep.mubr.msk.f32.mxu1 %vm12958_vm4, %v12959_v17 }
 0x44c   : > { %v11619_v56 = vpop.f32.mrb[2].mxu0 }
 0x44d   : > { %v13576_v16 = vadd.f32 %v11619_v56, %v13530_v51  ;;  %v3228_v29 = vpop.f32.mrb[3].mxu0 }
 0x44e   : > { %v13579_v5 = vadd.f32 %v3228_v29, %v13518_v41 }
 0x44f   : > { %v5244_v6 = vsel %vm5222_vm3, %v13576_v16, -inf }
 0x450   : > { %11738 = vmatmul.mubr.f32.vlgmr.msra.gmra.mrb[6].mxu0 %v13537_v49  ;;  %5245 = vmax.xlane.f32.xlu0 %v5244_v6  ;;  %v5241_v30 = vsel %vm5222_vm3, %v13579_v5, -inf }
 0x451   : > { %5242 = vmax.xlane.f32.xlu1 %v5241_v30  ;;  %11744 = vmatprep.mubr.msk.f32.mxu0 %vm12958_vm4, %v12959_v17 }
 0x45b   : > { %v13590_v4 = vpop.trf.xlu1 }
 0x46b   : > { %v13592_v7 = vpop.trf.xlu1 }
 0x46d   : > { %v13595_v35 = vpop.trf.xlu0 }
 0x497   : > { %v11679_v58 = vpop.f32.mrb[4].mxu0 }
 0x498   : > { %v4220_v31 = vpop.f32.mrb[5].mxu0  ;;  %v13630_v21 = vadd.f32 %v11679_v58, %v13530_v51 }
 0x499   : > { %v13613_v60 = vadd.f32 %v4220_v31, %v13518_v41 }
 0x49a   : > { %v5256_v62 = vsel %vm5222_vm3, %v13630_v21, -inf }
 0x49b   : > { %v5253_v3 = vsel %vm5222_vm3, %v13613_v60, -inf }
 0x4a3   : > { %v5225_v33 = vpop.xlane.xlu1 %5224 }
 0x4a4   : > { %v5271_v34 = vsub.f32 %v13522_v43, %v5225_v33 }
 0x4a6   : > { %v5287_v2 = vmul.f32 1.442695, %v5271_v34 }
 0x4a7   : > { %v5234_v50 = vpop.xlane.xlu1 %5233 }
 0x4a8   : > { %12682 = vpow2.f32 %v5287_v2  ;;  %v5274_v47 = vsub.f32 %v13533_v52, %v5234_v50 }
 0x4aa   : > { %v5293_v20 = vmul.f32 1.442695, %v5274_v47 }
 0x4ab   : > { %v5228_v36 = vpop.xlane.xlu0 %5227 }
 0x4ac   : > { %v5272_v37 = vsub.f32 %v13542_v55, %v5228_v36  ;;  %v5231_v52 = vpop.xlane.xlu1 %5230 }
 0x4ad   : > { %v5273_v26 = vsub.f32 %v13548_v14, %v5231_v52 }
 0x4ae   : > { %v5289_v38 = vmul.f32 1.442695, %v5272_v37 }
 0x4af   : > { %v5291_v61 = vmul.f32 1.442695, %v5273_v26 }
 0x4b0   : > { %12684 = vpow2.f32 %v5289_v38 }
 0x4b1   : > { %12686 = vpow2.f32 %v5293_v20 }
 0x4b2   : > { %v13598_v39 = vpop.eup %12682  ;;  %12688 = vpow2.f32 %v5291_v61 }
 0x4b3   : > { %v5319_v40 = vsel %vm5222_vm3, %v13598_v39, 0.0 }
 0x4b4   : > { %5320 = vadd.xlane.f32.xlu1 %v5319_v40 }
 0x4b8   : > { %v11589_v42 = vpop.f32.mrb[4].mxu1 }
 0x4b9   : > { %v2732_v45 = vpop.f32.mrb[5].mxu1  ;;  %v13608_v53 = vadd.f32 %v11589_v42, %v13530_v51 }
 0x4ba   : > { %v13602_v46 = vpop.eup %12684  ;;  %v13605_v43 = vadd.f32 %v2732_v45, %v13518_v41 }
 0x4bb   : > { %v5322_v49 = vsel %vm5222_vm3, %v13602_v46, 0.0  ;;  %v5238_v1 = vsel %vm5222_vm3, %v13608_v53, -inf  ;;  %v13639_v25 = vpop.eup %12686 }
 0x4bc   : > { %5323 = vadd.xlane.f32.xlu0 %v5322_v49  ;;  %v5235_v55 = vsel %vm5222_vm3, %v13605_v43, -inf  ;;  %v5328_v27 = vsel %vm5222_vm3, %v13639_v25, 0.0 }
 0x4bd   : > { %5236 = vmax.xlane.f32.xlu1 %v5235_v55 }
 0x4c0   : > { %5239 = vmax.xlane.f32.xlu0 %v5238_v1 }
 0x4c1   : > { %5254 = vmax.xlane.f32.xlu1 %v5253_v3 }
 0x4dd   : > { %v5246_v34 = vpop.xlane.xlu0 %5245 }
 0x4de   : > { %v5243_v33 = vpop.xlane.xlu1 %5242  ;;  %v5278_v2 = vsub.f32 %v13576_v16, %v5246_v34 }
 0x4df   : > { %v5277_v37 = vsub.f32 %v13579_v5, %v5243_v33 }
 0x4e0   : > { %v5301_v36 = vmul.f32 1.442695, %v5278_v2 }
 0x4e1   : > { %v5299_v45 = vmul.f32 1.442695, %v5277_v37 }
 0x4e4   : > { %v11649_v18 = vpop.f32.mrb[6].mxu1 }
 0x4e5   : > { %v3724_v19 = vpop.f32.mrb[7].mxu1  ;;  %v13633_v24 = vadd.f32 %v11649_v18, %v13530_v51 }
 0x4e6   : > { %v13648_v28 = vadd.f32 %v3724_v19, %v13518_v41 }
 0x4e8   : > { %v5247_v29 = vsel %vm5222_vm3, %v13648_v28, -inf }
 0x4ed   : > { %5543 = vxpose.xlu0.b32.start [1/2] (short) (narrow) %v13499_v32, 8  ;;  %v5250_v32 = vsel %vm5222_vm3, %v13633_v24, -inf }
 0x4f1   : > { %5544 = vxpose.xlu0.b32.end [2/2] (short) (narrow) %v5414_v0, 8  ;;  %v13669_v0 = vpop.eup %12688 }
 0x51b   : > { %v11709_v22 = vpop.f32.mrb[8].mxu1 }
 0x51c   : > { %v4716_v23 = vpop.f32.mrb[9].mxu1  ;;  %v13658_v14 = vadd.f32 %v11709_v22, %v13530_v51 }
 0x51d   : > { %v13663_v30 = vadd.f32 %v4716_v23, %v13518_v41 }
 0x51e   : > { %5257 = vmax.xlane.f32.xlu0 %v5256_v62  ;;  %v5262_v58 = vsel %vm5222_vm3, %v13658_v14, -inf }
 0x51f   : > { %v5259_v31 = vsel %vm5222_vm3, %v13663_v30, -inf }
 0x522   : > { %5251 = vmax.xlane.f32.xlu0 %v5250_v32 }
 0x523   : > { %v11739_v8 = vpop.f32.mrb[6].mxu0 }
 0x524   : > { %v13642_v13 = vadd.f32 %v11739_v8, %v13530_v51  ;;  %v5212_v59 = vpop.f32.mrb[7].mxu0  ;;  %v5325_v51 = vsel %vm5222_vm3, %v13669_v0, 0.0 }
 0x525   : > { %v13653_v56 = vadd.f32 %v5212_v59, %v13518_v41 }
 0x526   : > { %5329 = vadd.xlane.f32.xlu0 %v5328_v27  ;;  %v5268_v9 = vsel %vm5222_vm3, %v13642_v13, -inf }
 0x527   : > { %5269 = vmax.xlane.f32.xlu1 %v5268_v9  ;;  %v5265_v6 = vsel %vm5222_vm3, %v13653_v56, -inf }
 0x52b   : > { %5248 = vmax.xlane.f32.xlu1 %v5247_v29 }
 0x52f   : > { %5266 = vmax.xlane.f32.xlu1 %v5265_v6 }
 0x533   : > { %5263 = vmax.xlane.f32.xlu1 %v5262_v58 }
 0x537   : > { %5260 = vmax.xlane.f32.xlu1 %v5259_v31 }
 0x53b   : > { %5326 = vadd.xlane.f32.xlu1 %v5325_v51 }
 0x53c   : > { %5419 = vrot.lane.b32.xlu0 %v13352_v10, %s12956_s14  ;;  %v5704_v10 = vsel %vm5222_vm3, %v13590_v4, 0 }
 0x53d   : > { %v5779_v19 = vand.u32 4294901760, %v5704_v10 }
 0x53f   : > { %v5780_v22 = vsub.f32 %v5704_v10, %v5779_v19 }
 0x541   : > { %v5321_v41 = vpop.xlane.xlu1 %5320  ;;  %v5781_v62 = vand.u32 4294901760, %v5780_v22 }
 0x542   : > { %12690 = vrcp.f32 %v5321_v41 }
 0x543   : > { %v5782_v9 = vsub.f32 %v5780_v22, %v5781_v62 }
 0x545   : > { %v5783_v33 = vand.u32 4294901760, %v5782_v9 }
 0x549   : > { %v5324_v38 = vpop.xlane.xlu0 %5323 }
 0x54a   : > { %12692 = vrcp.f32 %v5324_v38  ;;  %v5237_v40 = vpop.xlane.xlu1 %5236 }
 0x54b   : > { %12694 = vpow2.f32 %v5301_v36  ;;  %v5275_v1 = vsub.f32 %v13605_v43, %v5237_v40 }
 0x54c   : > { %v12691_v42 = vpop.eup %12690  ;;  %12696 = vpow2.f32 %v5299_v45 }
 0x54d   : > { %v5368_v49 = vmul.f32 %v12691_v42, %v13598_v39  ;;  %v5240_v55 = vpop.xlane.xlu0 %5239  ;;  %v5295_v50 = vmul.f32 1.442695, %v5275_v1 }
 0x54e   : > { %v5276_v3 = vsub.f32 %v13608_v53, %v5240_v55  ;;  %v13725_v42 = vpop.xlane.xlu1 %5254 }
 0x54f   : > { %v5707_v16 = vsel %vm5222_vm3, %v5368_v49, 0 }
 0x550   : > { %v5297_v18 = vmul.f32 1.442695, %v5276_v3  ;;  %v5713_v5 = vand.u32 4294901760, %v5707_v16 }
 0x552   : > { %12698 = vpow2.f32 %v5297_v18  ;;  %v5791_v20 = vsub.f32 %v5707_v16, %v5713_v5 }
 0x553   : > { %12700 = vpow2.f32 %v5295_v50 }
 0x554   : > { %v12693_v47 = vpop.eup %12692  ;;  %v5792_v53 = vand.u32 4294901760, %v5791_v20 }
 0x555   : > { %v5370_v39 = vmul.f32 %v12693_v47, %v13602_v46  ;;  %v13684_v23 = vpop.eup %12694 }
 0x556   : > { %v5340_v32 = vsel %vm5222_vm3, %v13684_v23, 0.0  ;;  %v13689_v59 = vpop.eup %12696  ;;  %v5793_v46 = vsub.f32 %v5791_v20, %v5792_v53 }
 0x557   : > { %v5710_v4 = vsel %vm5222_vm3, %v5370_v39, 0  ;;  %v5337_v29 = vsel %vm5222_vm3, %v13689_v59, 0.0 }
 0x558   : > { %v5716_v43 = vand.u32 4294901760, %v5710_v4  ;;  %v5794_v31 = vand.u32 4294901760, %v5793_v46 }
 0x55a   : > { %v12191_v52 = vpack.c.bf16 %v5716_v43, %v5713_v5  ;;  %v5798_v8 = vsub.f32 %v5710_v4, %v5716_v43 }
 0x55b   : > { %5341 = vadd.xlane.f32.xlu0 %v5340_v32 }
 0x55c   : > { %v13691_v26 = vpop.eup %12698  ;;  %12192 = vmatpush3.bf16.xpose.msra.mxu0 %v12191_v52  ;;  %12201 = vmatpush3.bf16.xpose.msra.mxu1 %v12191_v52  ;;  %v5799_v27 = vand.u32 4294901760, %v5798_v8  ;;  %v12197_v36 = vpack.c.bf16 %v5798_v8, %v5791_v20 }
 0x55d   : > { %v5334_v61 = vsel %vm5222_vm3, %v13691_v26, 0.0  ;;  %12193 = vmatprep.subr.bf16.mxu0 %v12957_v15  ;;  %12202 = vmatprep.subr.bf16.mxu1 %v12957_v15  ;;  %v13699_v58 = vpop.eup %12700 }
 0x55e   : > { %5335 = vadd.xlane.f32.xlu1 %v5334_v61  ;;  %v5800_v6 = vsub.f32 %v5798_v8, %v5799_v27  ;;  %v5331_v34 = vsel %vm5222_vm3, %v13699_v58, 0.0  ;;  %v12203_v2 = vpack.c.bf16 %v5799_v27, %v5792_v53 }
 0x55f   : > { %5338 = vadd.xlane.f32.xlu0 %v5337_v29 }
 0x560   : > { %v5801_v51 = vand.u32 4294901760, %v5800_v6 }
 0x562   : > { %v12194_v41 = vpack.c.bf16 %v5801_v51, %v5794_v31 }
 0x563   : > { %11745 = vmatmul.mubr.f32.vlgmr.msra.gmra.mrb[8].mxu0 %v5783_v33  ;;  %11766 = vmatmul.mubr.f32.vlgmr.msra.gmra.mrb[10].mxu1 %v5781_v62 }
 0x564   : > { %5332 = vadd.xlane.f32.xlu0 %v5331_v34  ;;  %12195 = vmatpush3.bf16.xpose.msra.mxu0 %v12194_v41 }
 0x565   : > { %12204 = vmatpush3.bf16.xpose.msra.mxu1 %v12203_v2  ;;  %11751 = vmatprep.mubr.msk.f32.mxu0 %vm12958_vm4, %v12959_v17 }
 0x566   : > { %11772 = vmatprep.mubr.msk.f32.mxu1 %vm12958_vm4, %v12959_v17  ;;  %12196 = vmatprep.subr.bf16.mxu0 %v12957_v15 }
 0x567   : > { %12205 = vmatprep.subr.bf16.mxu1 %v12957_v15 }
 0x56b   : > { %11752 = vmatmul.mubr.f32.vlgmr.msra.gmra.mrb[8].mxu0 %v5779_v19 }
 0x56c   : > { %11773 = vmatmul.mubr.f32.vlgmr.msra.gmra.mrb[10].mxu1 %v5779_v19  ;;  %12198 = vmatpush3.bf16.xpose.msra.mxu0 %v12197_v36 }
 0x56d   : > { %12207 = vmatpush3.bf16.xpose.msra.mxu1 %v12191_v52  ;;  %11758 = vmatprep.mubr.msk.f32.mxu0 %vm12958_vm4, %v12959_v17  ;;  %v13723_v37 = vpop.trf.xlu0 }
 0x56e   : > { %11779 = vmatprep.mubr.msk.f32.mxu1 %vm12958_vm4, %v12959_v17  ;;  %12208 = vmatprep.subr.bf16.mxu0 %v12957_v15 }
 0x56f   : > { %12226 = vmatprep.subr.bf16.mxu1 %v12957_v15 }
 0x573   : > { %11759 = vmatmul.mubr.f32.vlgmr.msra.gmra.mrb[8].mxu0 %v5780_v22  ;;  %v6172_v22 = vsel %vm5222_vm3, %v13595_v35, 0 }
 0x574   : > { %11780 = vmatmul.mubr.f32.vlgmr.msra.gmra.mrb[10].mxu1 %v5779_v19  ;;  %11786 = vmatprep.mubr.msk.f32.mxu0 %vm12958_vm4, %v12959_v17  ;;  %v13752_v4 = vand.u32 4294901760, %v6172_v22 }
 0x575   : > { %11828 = vmatprep.mubr.msk.f32.mxu1 %vm12958_vm4, %v12959_v17 }
 0x57a   : > { %5427 = vrot.lane.b32.xlu0 %v13364_v12, %s12956_s14 }
 0x591   : > { %5575 = vxpose.xlu1.b32.start [1/2] (short) (narrow) %v13586_v48, 8 }
 0x595   : > { %5576 = vxpose.xlu1.b32.end [2/2] (short) (narrow) %v13588_v54, 8 }
 0x5ab   : > { %v5258_v38 = vpop.xlane.xlu0 %5257 }
 0x5ac   : > { %v5282_v3 = vsub.f32 %v13630_v21, %v5258_v38 }
 0x5ae   : > { %v5309_v5 = vmul.f32 1.442695, %v5282_v3 }
 0x5af   : > { %v5252_v40 = vpop.xlane.xlu0 %5251 }
 0x5b0   : > { %v5280_v45 = vsub.f32 %v13633_v24, %v5252_v40 }
 0x5b2   : > { %v5305_v49 = vmul.f32 1.442695, %v5280_v45 }
 0x5b3   : > { %5421 = vrot.lane.b32.xlu1 %v13326_v63, %s12956_s14  ;;  %v5330_v48 = vpop.xlane.xlu0 %5329 }
 0x5b4   : > { %12702 = vpow2.f32 %v5305_v49  ;;  %v13730_v55 = vpop.xlane.xlu1 %5269 }
 0x5b5   : > { %12704 = vrcp.f32 %v5330_v48 }
 0x5b7   : > { %v5420_v2 = vpop.permute.xlu0 %5419 }
 0x5b8   : > { %v13732_v12 = vpop.xlane.xlu1 %5248 }
 0x5bc   : > { %v13734_v54 = vpop.xlane.xlu1 %5266 }
 0x5be   : > { %v13736_v10 = vpop.eup %12702 }
 0x5bf   : > { %v5346_v1 = vsel %vm5222_vm3, %v13736_v10, 0.0  ;;  %v12705_v19 = vpop.eup %12704 }
 0x5c0   : > { %5347 = vadd.xlane.f32.xlu0 %v5346_v1  ;;  %v5264_v24 = vpop.xlane.xlu1 %5263  ;;  %v5374_v47 = vmul.f32 %v12705_v19, %v13639_v25  ;;  %v6248_v25 = vsub.f32 %v6172_v22, %v13752_v4  ;;  %v5281_v19 = vsub.f32 %v13613_v60, %v13725_v42  ;;  %v7108_v22 = vsel %vm5222_vm3, %v13723_v37, 0 }
 0x5c1   : > { %v5284_v63 = vsub.f32 %v13658_v14, %v5264_v24 }
 0x5c2   : > { %v6178_v20 = vsel %vm5222_vm3, %v5374_v47, 0  ;;  %v6249_v27 = vand.u32 4294901760, %v6248_v25  ;;  %v5307_v42 = vmul.f32 1.442695, %v5281_v19 }
 0x5c3   : > { %v5313_v16 = vmul.f32 1.442695, %v5284_v63  ;;  %v6184_v14 = vand.u32 4294901760, %v6178_v20 }
 0x5c4   : > { %v13742_v18 = vpop.xlane.xlu1 %5260  ;;  %v6250_v31 = vsub.f32 %v6248_v25, %v6249_v27 }
 0x5c5   : > { %12706 = vpow2.f32 %v5313_v16  ;;  %v6266_v62 = vsub.f32 %v6178_v20, %v6184_v14 }
 0x5c6   : > { %12708 = vpow2.f32 %v5309_v5  ;;  %v6251_v41 = vand.u32 4294901760, %v6250_v31 }
 0x5c7   : > { %v6267_v46 = vand.u32 4294901760, %v6266_v62 }
 0x5c8   : > { %v5327_v50 = vpop.xlane.xlu1 %5326 }
 0x5c9   : > { %12710 = vrcp.f32 %v5327_v50  ;;  %v6268_v6 = vsub.f32 %v6266_v62, %v6267_v46 }
 0x5cb   : > { %v6269_v33 = vand.u32 4294901760, %v6268_v6 }
 0x5cf   : > { %v13748_v39 = vpop.eup %12706 }
 0x5d0   : > { %v5358_v21 = vsel %vm5222_vm3, %v13748_v39, 0.0  ;;  %v13754_v43 = vpop.eup %12708 }
 0x5d1   : > { %5359 = vadd.xlane.f32.xlu0 %v5358_v21  ;;  %v5352_v35 = vsel %vm5222_vm3, %v13754_v43, 0.0 }
 0x5d3   : > { %v12711_v53 = vpop.eup %12710 }
 0x5d4   : > { %v5372_v32 = vmul.f32 %v12711_v53, %v13669_v0 }
 0x5d6   : > { %v6175_v52 = vsel %vm5222_vm3, %v5372_v32, 0 }
 0x5d7   : > { %5353 = vadd.xlane.f32.xlu1 %v5352_v35  ;;  %v6181_v8 = vand.u32 4294901760, %v6175_v52  ;;  %v13808_v35 = vand.u32 4294901760, %v7108_v22 }
 0x5d9   : > { %v13761_v9 = vpack.c.bf16 %v6184_v14, %v6181_v8  ;;  %v6259_v61 = vsub.f32 %v6175_v52, %v6181_v8  ;;  %v5279_v14 = vsub.f32 %v13648_v28, %v13732_v12 }
 0x5db   : > { %12210 = vmatpush3.bf16.xpose.msra.mxu0 %v13761_v9  ;;  %v6260_v29 = vand.u32 4294901760, %v6259_v61  ;;  %v12215_v38 = vpack.c.bf16 %v6266_v62, %v6259_v61 }
 0x5dc   : > { %12211 = vmatprep.subr.bf16.mxu0 %v12957_v15 }
 0x5dd   : > { %v6261_v0 = vsub.f32 %v6259_v61, %v6260_v29  ;;  %v12221_v50 = vpack.c.bf16 %v6267_v46, %v6260_v29  ;;  %v5303_v46 = vmul.f32 1.442695, %v5279_v14  ;;  %v13829_v29 = vsub.f32 %v7108_v22, %v13808_v35 }
 0x5df   : > { %v6262_v51 = vand.u32 4294901760, %v6261_v0 }
 0x5e1   : > { %v12212_v34 = vpack.c.bf16 %v6269_v33, %v6262_v51 }
 0x5e2   : > { %11787 = vmatmul.mubr.f32.vlgmr.msra.gmra.mrb[10].mxu0 %v6251_v41  ;;  %v7185_v41 = vand.u32 4294901760, %v13829_v29 }
 0x5e3   : > { %12213 = vmatpush3.bf16.xpose.msra.mxu0 %v12212_v34  ;;  %11793 = vmatprep.mubr.msk.f32.mxu0 %vm12958_vm4, %v12959_v17 }
 0x5e4   : > { %12214 = vmatprep.subr.bf16.mxu0 %v12957_v15 }
 0x5e8   : > { %v5342_v36 = vpop.xlane.xlu0 %5341  ;;  %5423 = vrot.lane.b32.xlu1 %v13360_v11, %s12956_s14 }
 0x5e9   : > { %12712 = vrcp.f32 %v5342_v36 }
 0x5ea   : > { %11794 = vmatmul.mubr.f32.vlgmr.msra.gmra.mrb[10].mxu0 %v13752_v4 }
 0x5eb   : > { %v5336_v40 = vpop.xlane.xlu1 %5335  ;;  %12216 = vmatpush3.bf16.xpose.msra.mxu0 %v12215_v38  ;;  %11800 = vmatprep.mubr.msk.f32.mxu0 %vm12958_vm4, %v12959_v17 }
 0x5ec   : > { %12714 = vrcp.f32 %v5336_v40  ;;  %5425 = vrot.lane.b32.xlu1 %v13394_v57, %s12956_s14  ;;  %v5339_v45 = vpop.xlane.xlu0 %5338  ;;  %12217 = vmatprep.subr.bf16.mxu0 %v12957_v15  ;;  %v6640_v57 = vsel %vm5222_vm3, %v13592_v7, 0 }
 0x5ed   : > { %12716 = vrcp.f32 %v5339_v45  ;;  %v13784_v63 = vand.u32 4294901760, %v6640_v57  ;;  %v7186_v45 = vsub.f32 %v13829_v29, %v7185_v41 }
 0x5f1   : > { %v5333_v49 = vpop.xlane.xlu0 %5332 }
 0x5f2   : > { %12718 = vrcp.f32 %v5333_v49  ;;  %11801 = vmatmul.mubr.f32.vlgmr.msra.gmra.mrb[10].mxu0 %v6248_v25 }
 0x5f3   : > { %12219 = vmatpush3.bf16.xpose.msra.mxu0 %v13761_v9  ;;  %11807 = vmatprep.mubr.msk.f32.mxu0 %vm12958_vm4, %v12959_v17  ;;  %v12713_v11 = vpop.eup %12712  ;;  %12720 = vpow2.f32 %v5307_v42 }
 0x5f4   : > { %12220 = vmatprep.subr.bf16.mxu0 %v12957_v15  ;;  %v5382_v16 = vmul.f32 %v12713_v11, %v13684_v23  ;;  %12722 = vpow2.f32 %v5303_v46 }
 0x5f6   : > { %v12715_v48 = vpop.eup %12714  ;;  %v7114_v60 = vsel %vm5222_vm3, %v5382_v16, 0 }
 0x5f7   : > { %v12717_v1 = vpop.eup %12716  ;;  %v5378_v24 = vmul.f32 %v12715_v48, %v13691_v26  ;;  %v13796_v26 = vsub.f32 %v6640_v57, %v13784_v63  ;;  %v7120_v32 = vand.u32 4294901760, %v7114_v60  ;;  %v7187_v57 = vand.u32 4294901760, %v7186_v45 }
 0x5f8   : > { %v5380_v3 = vmul.f32 %v12717_v1, %v13689_v59 }
 0x5f9   : > { %v6646_v5 = vsel %vm5222_vm3, %v5378_v24, 0 }
 0x5fa   : > { %v6652_v47 = vand.u32 4294901760, %v6646_v5  ;;  %11808 = vmatmul.mubr.f32.vlgmr.msra.gmra.mrb[10].mxu0 %v6249_v27  ;;  %v7111_v20 = vsel %vm5222_vm3, %v5380_v3, 0  ;;  %v13823_v27 = vsub.f32 %v7114_v60, %v7120_v32 }
 0x5fb   : > { %12222 = vmatpush3.bf16.xpose.msra.mxu0 %v12221_v50  ;;  %11814 = vmatprep.mubr.msk.f32.mxu0 %vm12958_vm4, %v12959_v17  ;;  %v7117_v21 = vand.u32 4294901760, %v7111_v20 }
 0x5fc   : > { %v12719_v7 = vpop.eup %12718  ;;  %v13793_v59 = vsub.f32 %v6646_v5, %v6652_v47  ;;  %12223 = vmatprep.subr.bf16.mxu0 %v12957_v15  ;;  %v7203_v51 = vand.u32 4294901760, %v13823_v27 }
 0x5fd   : > { %v5376_v23 = vmul.f32 %v12719_v7, %v13699_v58  ;;  %v6717_v58 = vand.u32 4294901760, %v13796_v26  ;;  %v13814_v37 = vsub.f32 %v7111_v20, %v7117_v21  ;;  %v13843_v38 = vpop.eup %12720  ;;  %v5285_v7 = vsub.f32 %v13653_v56, %v13734_v54 }
 0x5fe   : > { %5607 = vxpose.xlu0.b32.start [1/2] (short) (narrow) %v5420_v2, 8  ;;  %v6735_v25 = vand.u32 4294901760, %v13793_v59  ;;  %v13839_v2 = vpack.c.bf16 %v7120_v32, %v7117_v21  ;;  %v7204_v40 = vsub.f32 %v13823_v27, %v7203_v51  ;;  %v5349_v49 = vsel %vm5222_vm3, %v13843_v38, 0.0  ;;  %v13856_v48 = vpop.eup %12722 }
 0x5ff   : > { %v6643_v53 = vsel %vm5222_vm3, %v5376_v23, 0  ;;  %v6718_v61 = vsub.f32 %v13796_v26, %v6717_v58  ;;  %v7196_v6 = vand.u32 4294901760, %v13814_v37  ;;  %v5343_v3 = vsel %vm5222_vm3, %v13856_v48, 0.0 }
 0x600   : > { %v6649_v62 = vand.u32 4294901760, %v6643_v53  ;;  %v6736_v12 = vsub.f32 %v13793_v59, %v6735_v25  ;;  %v7205_v11 = vand.u32 4294901760, %v7204_v40  ;;  %v12251_v16 = vpack.c.bf16 %v13823_v27, %v13814_v37 }
 0x601   : > { %v6719_v33 = vand.u32 4294901760, %v6718_v61  ;;  %v7197_v36 = vsub.f32 %v13814_v37, %v7196_v6 }
 0x602   : > { %v13810_v52 = vpack.c.bf16 %v6652_v47, %v6649_v62  ;;  %v13812_v8 = vsub.f32 %v6643_v53, %v6649_v62  ;;  %11815 = vmatmul.mubr.f32.vlgmr.msra.gmra.mrb[10].mxu0 %v13752_v4  ;;  %v6737_v0 = vand.u32 4294901760, %v6736_v12  ;;  %v12257_v47 = vpack.c.bf16 %v7203_v51, %v7196_v6 }
 0x603   : > { %12225 = vmatpush3.bf16.xpose.msra.mxu0 %v13761_v9  ;;  %11821 = vmatprep.mubr.msk.f32.mxu0 %vm12958_vm4, %v12959_v17 }
 0x604   : > { %12228 = vmatpush3.bf16.xpose.msra.mxu1 %v13810_v52  ;;  %v6728_v28 = vand.u32 4294901760, %v13812_v8  ;;  %12244 = vmatprep.subr.bf16.mxu0 %v12957_v15  ;;  %v12233_v1 = vpack.c.bf16 %v13793_v59, %v13812_v8 }
 0x605   : > { %12229 = vmatprep.subr.bf16.mxu1 %v12957_v15 }
 0x606   : > { %v6729_v9 = vsub.f32 %v13812_v8, %v6728_v28  ;;  %v12239_v19 = vpack.c.bf16 %v6735_v25, %v6728_v28  ;;  %v5428_v25 = vpop.permute.xlu0 %5427 }
 0x608   : > { %v6730_v31 = vand.u32 4294901760, %v6729_v9 }
 0x60a   : > { %v12230_v34 = vpack.c.bf16 %v6737_v0, %v6730_v31  ;;  %11822 = vmatmul.mubr.f32.vlgmr.msra.gmra.mrb[10].mxu0 %v13752_v4  ;;  %v7198_v4 = vand.u32 4294901760, %v7197_v36 }
 0x60b   : > { %11829 = vmatmul.mubr.f32.vlgmr.msra.gmra.mrb[12].mxu1 %v6719_v33  ;;  %12246 = vmatpush3.bf16.xpose.msra.mxu0 %v13839_v2 }
 0x60c   : > { %12231 = vmatpush3.bf16.xpose.msra.mxu1 %v12230_v34  ;;  %11835 = vmatprep.mubr.msk.f32.mxu1 %vm12958_vm4, %v12959_v17  ;;  %v12248_v24 = vpack.c.bf16 %v7205_v11, %v7198_v4 }
 0x60d   : > { %11870 = vmatprep.mubr.msk.f32.mxu0 %vm12958_vm4, %v12959_v17  ;;  %12232 = vmatprep.subr.bf16.mxu1 %v12957_v15 }
 0x60e   : > { %12247 = vmatprep.subr.bf16.mxu0 %v12957_v15 }
 0x610   : > { %5350 = vadd.xlane.f32.xlu1 %v5349_v49 }
 0x611   : > { %v13880_v5 = vpop.trf.xlu1 }
 0x612   : > { %11871 = vmatmul.mubr.f32.vlgmr.msra.gmra.mrb[12].mxu0 %v7187_v57  ;;  %v7576_v31 = vsel %vm5222_vm3, %v13880_v5, 0 }
 0x613   : > { %11836 = vmatmul.mubr.f32.vlgmr.msra.gmra.mrb[12].mxu1 %v13784_v63  ;;  %12249 = vmatpush3.bf16.xpose.msra.mxu0 %v12248_v24  ;;  %v13950_v34 = vand.u32 4294901760, %v7576_v31 }
 0x614   : > { %12234 = vmatpush3.bf16.xpose.msra.mxu1 %v12233_v1  ;;  %5344 = vadd.xlane.f32.xlu1 %v5343_v3 }
 0x615   : > { %11842 = vmatprep.mubr.msk.f32.mxu1 %vm12958_vm4, %v12959_v17  ;;  %11877 = vmatprep.mubr.msk.f32.mxu0 %vm12958_vm4, %v12959_v17  ;;  %v13958_v11 = vsub.f32 %v7576_v31, %v13950_v34 }
 0x616   : > { %12235 = vmatprep.subr.bf16.mxu1 %v12957_v15  ;;  %12250 = vmatprep.subr.bf16.mxu0 %v12957_v15 }
 0x61a   : > { %11878 = vmatmul.mubr.f32.vlgmr.msra.gmra.mrb[12].mxu0 %v13808_v35 }
 0x61b   : > { %11843 = vmatmul.mubr.f32.vlgmr.msra.gmra.mrb[12].mxu1 %v13796_v26  ;;  %12252 = vmatpush3.bf16.xpose.msra.mxu0 %v12251_v16 }
 0x61c   : > { %12237 = vmatpush3.bf16.xpose.msra.mxu1 %v13810_v52  ;;  %11849 = vmatprep.mubr.msk.f32.mxu1 %vm12958_vm4, %v12959_v17 }
 0x61d   : > { %11884 = vmatprep.mubr.msk.f32.mxu0 %vm12958_vm4, %v12959_v17  ;;  %12238 = vmatprep.subr.bf16.mxu1 %v12957_v15 }
 0x61e   : > { %12253 = vmatprep.subr.bf16.mxu0 %v12957_v15 }
 0x622   : > { %11885 = vmatmul.mubr.f32.vlgmr.msra.gmra.mrb[12].mxu0 %v13829_v29 }
 0x623   : > { %11850 = vmatmul.mubr.f32.vlgmr.msra.gmra.mrb[12].mxu1 %v6717_v58  ;;  %12255 = vmatpush3.bf16.xpose.msra.mxu0 %v13839_v2 }
 0x624   : > { %12240 = vmatpush3.bf16.xpose.msra.mxu1 %v12239_v19  ;;  %11856 = vmatprep.mubr.msk.f32.mxu1 %vm12958_vm4, %v12959_v17 }
 0x625   : > { %v5422_v50 = vpop.permute.xlu1 %5421  ;;  %11891 = vmatprep.mubr.msk.f32.mxu0 %vm12958_vm4, %v12959_v17  ;;  %5429 = vrot.lane.b32.xlu1 %v13390_v44, %s12956_s14  ;;  %v5286_v44 = vsub.f32 %v13642_v13, %v13730_v55  ;;  %v5283_v13 = vsub.f32 %v13663_v30, %v13742_v18 }
 0x626   : > { %5608 = vxpose.xlu0.b32.end [2/2] (short) (narrow) %v5422_v50, 8  ;;  %12241 = vmatprep.subr.bf16.mxu1 %v12957_v15 }
 0x627   : > { %12256 = vmatprep.subr.bf16.mxu0 %v12957_v15  ;;  %v5317_v20 = vmul.f32 1.442695, %v5286_v44  ;;  %v5311_v55 = vmul.f32 1.442695, %v5283_v13 }
 0x629   : > { %12724 = vpow2.f32 %v5317_v20 }
 0x62a   : > { %11892 = vmatmul.mubr.f32.vlgmr.msra.gmra.mrb[12].mxu0 %v7185_v41 }
 0x62b   : > { %11857 = vmatmul.mubr.f32.vlgmr.msra.gmra.mrb[12].mxu1 %v13784_v63  ;;  %12258 = vmatpush3.bf16.xpose.msra.mxu0 %v12257_v47  ;;  %v7653_v47 = vand.u32 4294901760, %v13958_v11 }
 0x62c   : > { %12243 = vmatpush3.bf16.xpose.msra.mxu1 %v13810_v52  ;;  %11863 = vmatprep.mubr.msk.f32.mxu1 %vm12958_vm4, %v12959_v17 }
 0x62d   : > { %11898 = vmatprep.mubr.msk.f32.mxu0 %vm12958_vm4, %v12959_v17  ;;  %12259 = vmatprep.subr.bf16.mxu0 %v12957_v15 }
 0x62e   : > { %12262 = vmatprep.subr.bf16.mxu1 %v12957_v15 }
 0x632   : > { %11899 = vmatmul.mubr.f32.vlgmr.msra.gmra.mrb[12].mxu0 %v13808_v35 }
 0x633   : > { %11864 = vmatmul.mubr.f32.vlgmr.msra.gmra.mrb[12].mxu1 %v13784_v63  ;;  %12261 = vmatpush3.bf16.xpose.msra.mxu0 %v13839_v2  ;;  %v5315_v63 = vmul.f32 1.442695, %v5285_v7  ;;  %v13921_v59 = vpop.eup %12724 }
 0x634   : > { %11905 = vmatprep.mubr.msk.f32.mxu0 %vm12958_vm4, %v12959_v17  ;;  %12280 = vmatprep.subr.bf16.mxu0 %v12957_v15  ;;  %v5364_v54 = vsel %vm5222_vm3, %v13921_v59, 0.0 }
 0x635   : > { %11912 = vmatprep.mubr.msk.f32.mxu1 %vm12958_vm4, %v12959_v17  ;;  %12726 = vpow2.f32 %v5315_v63 }
 0x636   : > { %12728 = vpow2.f32 %v5311_v55 }
 0x63a   : > { %11906 = vmatmul.mubr.f32.vlgmr.msra.gmra.mrb[12].mxu0 %v13808_v35 }
 0x63b   : > { %11954 = vmatprep.mubr.msk.f32.mxu0 %vm12958_vm4, %v12959_v17 }
 0x63f   : > { %v13925_v22 = vpop.eup %12726 }
 0x640   : > { %v5361_v30 = vsel %vm5222_vm3, %v13925_v22, 0.0  ;;  %v13929_v18 = vpop.eup %12728 }
 0x641   : > { %v5355_v21 = vsel %vm5222_vm3, %v13929_v18, 0.0 }
 0x646   : > { %v5942_v26 = vpop.f32.mrb[8].mxu0 }
 0x647   : > { %v6167_v23 = vpop.f32.mrb[10].mxu1  ;;  %v11760_v60 = vpop.f32.mrb[9].mxu0 }
 0x648   : > { %v12400_v42 = vadd.f32 %v6167_v23, %v5942_v26  ;;  %v11781_v56 = vpop.f32.mrb[11].mxu1  ;;  %v7654_v23 = vsub.f32 %v13958_v11, %v7653_v47 }
 0x649   : > { %5365 = vadd.xlane.f32.xlu1 %v5364_v54 }
 0x64d   : > { %5362 = vadd.xlane.f32.xlu1 %v5361_v30  ;;  %v5348_v32 = vpop.xlane.xlu0 %5347  ;;  %v7655_v30 = vand.u32 4294901760, %v7654_v23 }
 0x651   : > { %5356 = vadd.xlane.f32.xlu1 %v5355_v21 }
 0x65e   : > { %v13934_v8 = vpop.xlane.xlu0 %5359 }
 0x664   : > { %v5354_v14 = vpop.xlane.xlu1 %5353 }
 0x665   : > { %12730 = vrcp.f32 %v5354_v14 }
 0x666   : > { %12732 = vrcp.f32 %v5348_v32 }
 0x668   : > { %v5424_v53 = vpop.permute.xlu1 %5423 }
 0x669   : > { %5639 = vxpose.xlu0.b32.start [1/2] (short) (narrow) %v5424_v53, 8 }
 0x66c   : > { %v5426_v62 = vpop.permute.xlu1 %5425 }
 0x66d   : > { %5640 = vxpose.xlu0.b32.end [2/2] (short) (narrow) %v5426_v62, 8 }
 0x66f   : > { %v12731_v58 = vpop.eup %12730 }
 0x670   : > { %v5390_v35 = vmul.f32 %v12731_v58, %v13754_v43  ;;  %v12733_v37 = vpop.eup %12732 }
 0x671   : > { %9447 = vxpose.xlu0.b32.start.end [1/1] (short) (narrow) %v12400_v42, 16  ;;  %v5386_v28 = vmul.f32 %v12733_v37, %v13736_v10 }
 0x672   : > { %v8050_v46 = vsel %vm5222_vm3, %v5390_v35, 0 }
 0x673   : > { %v8056_v9 = vand.u32 4294901760, %v8050_v46  ;;  %v7582_v43 = vsel %vm5222_vm3, %v5386_v28, 0 }
 0x674   : > { %v7588_v41 = vand.u32 4294901760, %v7582_v43 }
 0x675   : > { %v13947_v10 = vsub.f32 %v8050_v46, %v8056_v9 }
 0x676   : > { %v13955_v49 = vsub.f32 %v7582_v43, %v7588_v41 }
 0x677   : > { %v8139_v45 = vand.u32 4294901760, %v13947_v10 }
 0x678   : > { %v7671_v50 = vand.u32 4294901760, %v13955_v49 }
 0x679   : > { %v8140_v5 = vsub.f32 %v13947_v10, %v8139_v45 }
 0x67a   : > { %v7672_v26 = vsub.f32 %v13955_v49, %v7671_v50 }
 0x67b   : > { %v8141_v13 = vand.u32 4294901760, %v8140_v5 }
 0x67c   : > { %v7673_v54 = vand.u32 4294901760, %v7672_v26 }
 0x684   : > { %5671 = vxpose.xlu1.b32.start [1/2] (short) (narrow) %v5428_v25, 8 }
 0x69d   : > { %v5351_v52 = vpop.xlane.xlu1 %5350 }
 0x69e   : > { %12734 = vrcp.f32 %v5351_v52 }
 0x6a1   : > { %v5345_v12 = vpop.xlane.xlu1 %5344 }
 0x6a2   : > { %v5623_v27 = vpop.trf.xlu0  ;;  %12736 = vrcp.f32 %v5345_v12 }
 0x6a3   : > { %v8044_v61 = vsel %vm5222_vm3, %v5623_v27, 0  ;;  %12738 = vrcp.f32 %v13934_v8 }
 0x6a4   : > { %v13939_v29 = vand.u32 4294901760, %v8044_v61 }
 0x6a5   : > { %v5430_v6 = vpop.permute.xlu1 %5429 }
 0x6a6   : > { %5672 = vxpose.xlu1.b32.end [2/2] (short) (narrow) %v5430_v6, 8  ;;  %v13945_v0 = vsub.f32 %v8044_v61, %v13939_v29 }
 0x6a8   : > { %v12735_v51 = vpop.eup %12734  ;;  %v8121_v2 = vand.u32 4294901760, %v13945_v0 }
 0x6a9   : > { %v5388_v33 = vmul.f32 %v12735_v51, %v13843_v38 }
 0x6aa   : > { %v8122_v24 = vsub.f32 %v13945_v0, %v8121_v2 }
 0x6ab   : > { %v8047_v36 = vsel %vm5222_vm3, %v5388_v33, 0 }
 0x6ac   : > { %v8053_v40 = vand.u32 4294901760, %v8047_v36  ;;  %v12737_v4 = vpop.eup %12736  ;;  %v8123_v44 = vand.u32 4294901760, %v8122_v24 }
 0x6ad   : > { %v5384_v57 = vmul.f32 %v12737_v4, %v13856_v48  ;;  %v12739_v35 = vpop.eup %12738 }
 0x6ae   : > { %v13961_v1 = vpack.c.bf16 %v8056_v9, %v8053_v40  ;;  %v8131_v38 = vsub.f32 %v8047_v36, %v8053_v40  ;;  %v5394_v8 = vmul.f32 %v12739_v35, %v13748_v39  ;;  %v12960_v35 = vmov 1983009808  }
 0x6af   : > { %v7579_v3 = vsel %vm5222_vm3, %v5384_v57, 0 }
 0x6b0   : > { %12282 = vmatpush3.bf16.xpose.msra.mxu0 %v13961_v1  ;;  %v8132_v16 = vand.u32 4294901760, %v8131_v38  ;;  %v7585_v19 = vand.u32 4294901760, %v7579_v3  ;;  %v12287_v14 = vpack.c.bf16 %v13947_v10, %v8131_v38  ;;  %v8518_v27 = vsel %vm5222_vm3, %v5394_v8, 0 }
 0x6b1   : > { %12283 = vmatprep.subr.bf16.mxu0 %v12957_v15  ;;  %v8524_v61 = vand.u32 4294901760, %v8518_v27  ;;  %v9708_v8 = vlaneseq }
 0x6b2   : > { %v8133_v48 = vsub.f32 %v8131_v38, %v8132_v16  ;;  %v12263_v20 = vpack.c.bf16 %v7588_v41, %v7585_v19  ;;  %v7663_v7 = vsub.f32 %v7579_v3, %v7585_v19  ;;  %v12293_v62 = vpack.c.bf16 %v8139_v45, %v8132_v16 }
 0x6b3   : > { %v8606_v10 = vsub.f32 %v8518_v27, %v8524_v61 }
 0x6b4   : > { %v8134_v63 = vand.u32 4294901760, %v8133_v48  ;;  %12264 = vmatpush3.bf16.xpose.msra.mxu1 %v12263_v20  ;;  %v7664_v55 = vand.u32 4294901760, %v7663_v7  ;;  %v12269_v53 = vpack.c.bf16 %v13955_v49, %v7663_v7 }
 0x6b5   : > { %12265 = vmatprep.subr.bf16.mxu1 %v12957_v15  ;;  %v8607_v40 = vand.u32 4294901760, %v8606_v10 }
 0x6b6   : > { %v12284_v60 = vpack.c.bf16 %v8141_v13, %v8134_v63  ;;  %v7665_v42 = vsub.f32 %v7663_v7, %v7664_v55  ;;  %v12275_v25 = vpack.c.bf16 %v7671_v50, %v7664_v55 }
 0x6b7   : > { %11955 = vmatmul.mubr.f32.vlgmr.msra.gmra.mrb[14].mxu0 %v8123_v44 }
 0x6b8   : > { %12285 = vmatpush3.bf16.xpose.msra.mxu0 %v12284_v60  ;;  %11961 = vmatprep.mubr.msk.f32.mxu0 %vm12958_vm4, %v12959_v17  ;;  %v7666_v56 = vand.u32 4294901760, %v7665_v42 }
 0x6b9   : > { %12286 = vmatprep.subr.bf16.mxu0 %v12957_v15 }
 0x6ba   : > { %v12266_v21 = vpack.c.bf16 %v7673_v54, %v7666_v56 }
 0x6bb   : > { %11913 = vmatmul.mubr.f32.vlgmr.msra.gmra.mrb[14].mxu1 %v7655_v30 }
 0x6bc   : > { %12267 = vmatpush3.bf16.xpose.msra.mxu1 %v12266_v21  ;;  %11919 = vmatprep.mubr.msk.f32.mxu1 %vm12958_vm4, %v12959_v17 }
 0x6bd   : > { %12268 = vmatprep.subr.bf16.mxu1 %v12957_v15 }
 0x6bf   : > { %11962 = vmatmul.mubr.f32.vlgmr.msra.gmra.mrb[14].mxu0 %v13939_v29 }
 0x6c0   : > { %12288 = vmatpush3.bf16.xpose.msra.mxu0 %v12287_v14  ;;  %11968 = vmatprep.mubr.msk.f32.mxu0 %vm12958_vm4, %v12959_v17 }
 0x6c1   : > { %12289 = vmatprep.subr.bf16.mxu0 %v12957_v15 }
 0x6c3   : > { %11920 = vmatmul.mubr.f32.vlgmr.msra.gmra.mrb[14].mxu1 %v13950_v34 }
 0x6c4   : > { %12270 = vmatpush3.bf16.xpose.msra.mxu1 %v12269_v53  ;;  %11926 = vmatprep.mubr.msk.f32.mxu1 %vm12958_vm4, %v12959_v17 }
 0x6c5   : > { %12271 = vmatprep.subr.bf16.mxu1 %v12957_v15 }
 0x6c7   : > { %11969 = vmatmul.mubr.f32.vlgmr.msra.gmra.mrb[14].mxu0 %v13945_v0 }
 0x6c8   : > { %12291 = vmatpush3.bf16.xpose.msra.mxu0 %v13961_v1  ;;  %11975 = vmatprep.mubr.msk.f32.mxu0 %vm12958_vm4, %v12959_v17 }
 0x6c9   : > { %12292 = vmatprep.subr.bf16.mxu0 %v12957_v15 }
 0x6cb   : > { %11927 = vmatmul.mubr.f32.vlgmr.msra.gmra.mrb[14].mxu1 %v13958_v11 }
 0x6cc   : > { %12273 = vmatpush3.bf16.xpose.msra.mxu1 %v12263_v20  ;;  %11933 = vmatprep.mubr.msk.f32.mxu1 %vm12958_vm4, %v12959_v17 }
 0x6cd   : > { %12274 = vmatprep.subr.bf16.mxu1 %v12957_v15 }
 0x6cf   : > { %11976 = vmatmul.mubr.f32.vlgmr.msra.gmra.mrb[14].mxu0 %v8121_v2 }
 0x6d0   : > { %12294 = vmatpush3.bf16.xpose.msra.mxu0 %v12293_v62  ;;  %11982 = vmatprep.mubr.msk.f32.mxu0 %vm12958_vm4, %v12959_v17 }
 0x6d1   : > { %12295 = vmatprep.subr.bf16.mxu0 %v12957_v15 }
 0x6d3   : > { %11934 = vmatmul.mubr.f32.vlgmr.msra.gmra.mrb[14].mxu1 %v7653_v47 }
 0x6d4   : > { %12276 = vmatpush3.bf16.xpose.msra.mxu1 %v12275_v25  ;;  %11940 = vmatprep.mubr.msk.f32.mxu1 %vm12958_vm4, %v12959_v17 }
 0x6d5   : > { %12277 = vmatprep.subr.bf16.mxu1 %v12957_v15 }
 0x6d6   : > { %v5366_v32 = vpop.xlane.xlu1 %5365 }
 0x6d7   : > { %11983 = vmatmul.mubr.f32.vlgmr.msra.gmra.mrb[14].mxu0 %v13939_v29  ;;  %12740 = vrcp.f32 %v5366_v32 }
 0x6d8   : > { %12297 = vmatpush3.bf16.xpose.msra.mxu0 %v13961_v1  ;;  %11989 = vmatprep.mubr.msk.f32.mxu0 %vm12958_vm4, %v12959_v17  ;;  %v8608_v1 = vsub.f32 %v8606_v10, %v8607_v40 }
 0x6d9   : > { %12316 = vmatprep.subr.bf16.mxu0 %v12957_v15 }
 0x6da   : > { %v5363_v58 = vpop.xlane.xlu1 %5362  ;;  %v8609_v3 = vand.u32 4294901760, %v8608_v1 }
 0x6db   : > { %12742 = vrcp.f32 %v5363_v58  ;;  %11941 = vmatmul.mubr.f32.vlgmr.msra.gmra.mrb[14].mxu1 %v13950_v34 }
 0x6dc   : > { %12279 = vmatpush3.bf16.xpose.msra.mxu1 %v12263_v20  ;;  %11947 = vmatprep.mubr.msk.f32.mxu1 %vm12958_vm4, %v12959_v17 }
 0x6dd   : > { %v6635_v52 = vpop.f32.mrb[10].mxu0  ;;  %12298 = vmatprep.subr.bf16.mxu1 %v12957_v15 }
 0x6de   : > { %v11823_v37 = vpop.f32.mrb[11].mxu0  ;;  %9479 = vxpose.xlu0.b32.start.end [1/1] (short) (narrow) %v6635_v52, 16  ;;  %v5357_v46 = vpop.xlane.xlu1 %5356  ;;  %v9706_v52 = vunpack.c.l.s4 %v12960_v35 }
 0x6df   : > { %11990 = vmatmul.mubr.f32.vlgmr.msra.gmra.mrb[14].mxu0 %v13939_v29  ;;  %12744 = vrcp.f32 %v5357_v46 }
 0x6e0   : > { %12038 = vmatprep.mubr.msk.f32.mxu0 %vm12958_vm4, %v12959_v17 }
 0x6e1   : > { %v12741_v28 = vpop.eup %12740 }
 0x6e2   : > { %v5398_v12 = vmul.f32 %v12741_v28, %v13921_v59  ;;  %v9707_v28 = vunpack.c.0.s8 %v9706_v52 }
 0x6e3   : > { %11948 = vmatmul.mubr.f32.vlgmr.msra.gmra.mrb[14].mxu1 %v13950_v34 }
 0x6e4   : > { %11996 = vmatprep.mubr.msk.f32.mxu1 %vm12958_vm4, %v12959_v17  ;;  %v8986_v29 = vsel %vm5222_vm3, %v5398_v12, 0  ;;  %v9709_v12 = vshrl.u32 %v9708_v8, 7 }
 0x6e5   : > { %v12743_v39 = vpop.eup %12742  ;;  %v8992_v51 = vand.u32 4294901760, %v8986_v29 }
 0x6e6   : > { %v5396_v9 = vmul.f32 %v12743_v39, %v13925_v22  ;;  %v12961_v39 = vmov 1934713408  }
 0x6e7   : > { %v9074_v7 = vsub.f32 %v8986_v29, %v8992_v51 }
 0x6e8   : > { %v8983_v43 = vsel %vm5222_vm3, %v5396_v9, 0 }
 0x6e9   : > { %v5655_v6 = vpop.trf.xlu0  ;;  %v12745_v31 = vpop.eup %12744  ;;  %v8989_v59 = vand.u32 4294901760, %v8983_v43  ;;  %v9075_v26 = vand.u32 4294901760, %v9074_v7 }
 0x6ea   : > { %v8512_v0 = vsel %vm5222_vm3, %v5655_v6, 0  ;;  %v5392_v33 = vmul.f32 %v12745_v31, %v13929_v18  ;;  %v14065_v6 = vsub.s32 %v9707_v28, %v9709_v12 }
 0x6eb   : > { %v8587_v41 = vand.u32 4294901760, %v8512_v0  ;;  %v14028_v34 = vpack.c.bf16 %v8992_v51, %v8989_v59  ;;  %v9067_v20 = vsub.f32 %v8983_v43, %v8989_v59  ;;  %v9076_v56 = vsub.f32 %v9074_v7, %v9075_v26 }
 0x6ec   : > { %v8515_v36 = vsel %vm5222_vm3, %v5392_v33, 0 }
 0x6ed   : > { %v8588_v2 = vsub.f32 %v8512_v0, %v8587_v41  ;;  %12318 = vmatpush3.bf16.xpose.msra.mxu0 %v14028_v34  ;;  %v8521_v22 = vand.u32 4294901760, %v8515_v36  ;;  %v9068_v63 = vand.u32 4294901760, %v9067_v20  ;;  %v9077_v14 = vand.u32 4294901760, %v9076_v56 }
 0x6ee   : > { %12319 = vmatprep.subr.bf16.mxu0 %v12957_v15  ;;  %v12323_v25 = vpack.c.bf16 %v9074_v7, %v9067_v20 }
 0x6ef   : > { %v8589_v45 = vand.u32 4294901760, %v8588_v2  ;;  %v12299_v4 = vpack.c.bf16 %v8524_v61, %v8521_v22  ;;  %v8599_v49 = vsub.f32 %v8515_v36, %v8521_v22  ;;  %v9069_v60 = vsub.f32 %v9067_v20, %v9068_v63 }
 0x6f0   : > { %v12329_v32 = vpack.c.bf16 %v9075_v26, %v9068_v63  ;;  %v9770_v61 = vunpack.c.l.s4 %v12961_v39 }
 0x6f1   : > { %v8590_v11 = vsub.f32 %v8588_v2, %v8589_v45  ;;  %12300 = vmatpush3.bf16.xpose.msra.mxu1 %v12299_v4  ;;  %v8600_v57 = vand.u32 4294901760, %v8599_v49  ;;  %v12305_v5 = vpack.c.bf16 %v8606_v10, %v8599_v49  ;;  %v9070_v30 = vand.u32 4294901760, %v9069_v60  ;;  %v9463_v58 = vpop.trf.xlu0 }
 0x6f2   : > { %12301 = vmatprep.subr.bf16.mxu1 %v12957_v15  ;;  %v9771_v43 = vunpack.c.0.s8 %v9770_v61 }
 0x6f3   : > { %v8601_v18 = vsub.f32 %v8599_v49, %v8600_v57  ;;  %v8591_v38 = vand.u32 4294901760, %v8590_v11  ;;  %v12311_v44 = vpack.c.bf16 %v8607_v40, %v8600_v57  ;;  %v12320_v62 = vpack.c.bf16 %v9077_v14, %v9070_v30 }
 0x6f4   : > { %v14071_v36 = vsub.s32 %v9771_v43, %v9709_v12 }
 0x6f5   : > { %v8602_v24 = vand.u32 4294901760, %v8601_v18  ;;  %v9464_v37 = vpop.trf.xlu0 }
 0x6f7   : > { %v12302_v16 = vpack.c.bf16 %v8609_v3, %v8602_v24 }
 0x6f8   : > { %11997 = vmatmul.mubr.f32.vlgmr.msra.gmra.mrb[16].mxu1 %v8591_v38 }
 0x6f9   : > { %12303 = vmatpush3.bf16.xpose.msra.mxu1 %v12302_v16  ;;  %12003 = vmatprep.mubr.msk.f32.mxu1 %vm12958_vm4, %v12959_v17 }
 0x6fa   : > { %12304 = vmatprep.subr.bf16.mxu1 %v12957_v15 }
 0x700   : > { %12004 = vmatmul.mubr.f32.vlgmr.msra.gmra.mrb[16].mxu1 %v8587_v41 }
 0x701   : > { %12306 = vmatpush3.bf16.xpose.msra.mxu1 %v12305_v5  ;;  %12010 = vmatprep.mubr.msk.f32.mxu1 %vm12958_vm4, %v12959_v17 }
 0x702   : > { %12307 = vmatprep.subr.bf16.mxu1 %v12957_v15 }
 0x706   : > { %v7103_v19 = vpop.f32.mrb[12].mxu1 }
 0x707   : > { %v11865_v50 = vpop.f32.mrb[13].mxu1  ;;  %9511 = vxpose.xlu1.b32.start.end [1/1] (short) (narrow) %v7103_v19, 16 }
 0x708   : > { %12011 = vmatmul.mubr.f32.vlgmr.msra.gmra.mrb[16].mxu1 %v8588_v2 }
 0x709   : > { %12309 = vmatpush3.bf16.xpose.msra.mxu1 %v12299_v4  ;;  %12017 = vmatprep.mubr.msk.f32.mxu1 %vm12958_vm4, %v12959_v17 }
 0x70a   : > { %12310 = vmatprep.subr.bf16.mxu1 %v12957_v15 }
 0x70d   : > { %v7571_v47 = vpop.f32.mrb[12].mxu0 }
 0x70e   : > { %v11907_v48 = vpop.f32.mrb[13].mxu0  ;;  %9543 = vxpose.xlu1.b32.start.end [1/1] (short) (narrow) %v7571_v47, 16 }
 0x710   : > { %12018 = vmatmul.mubr.f32.vlgmr.msra.gmra.mrb[16].mxu1 %v8589_v45 }
 0x711   : > { %12312 = vmatpush3.bf16.xpose.msra.mxu1 %v12311_v44  ;;  %12024 = vmatprep.mubr.msk.f32.mxu1 %vm12958_vm4, %v12959_v17 }
 0x712   : > { %12313 = vmatprep.subr.bf16.mxu1 %v12957_v15 }
 0x718   : > { %12025 = vmatmul.mubr.f32.vlgmr.msra.gmra.mrb[16].mxu1 %v8587_v41 }
 0x719   : > { %12315 = vmatpush3.bf16.xpose.msra.mxu1 %v12299_v4  ;;  %12031 = vmatprep.mubr.msk.f32.mxu1 %vm12958_vm4, %v12959_v17 }
 0x720   : > { %12032 = vmatmul.mubr.f32.vlgmr.msra.gmra.mrb[16].mxu1 %v8587_v41 }
 0x722   : > { %v5687_v13 = vpop.trf.xlu1 }
 0x723   : > { %v8980_v55 = vsel %vm5222_vm3, %v5687_v13, 0 }
 0x724   : > { %v9055_v23 = vand.u32 4294901760, %v8980_v55 }
 0x726   : > { %v9056_v42 = vsub.f32 %v8980_v55, %v9055_v23 }
 0x728   : > { %v9057_v54 = vand.u32 4294901760, %v9056_v42 }
 0x72a   : > { %v9058_v21 = vsub.f32 %v9056_v42, %v9057_v54 }
 0x72c   : > { %v9059_v53 = vand.u32 4294901760, %v9058_v21 }
 0x72e   : > { %12039 = vmatmul.mubr.f32.vlgmr.msra.gmra.mrb[16].mxu0 %v9059_v53 }
 0x72f   : > { %12321 = vmatpush3.bf16.xpose.msra.mxu0 %v12320_v62  ;;  %12045 = vmatprep.mubr.msk.f32.mxu0 %vm12958_vm4, %v12959_v17 }
 0x730   : > { %12322 = vmatprep.subr.bf16.mxu0 %v12957_v15 }
 0x736   : > { %12046 = vmatmul.mubr.f32.vlgmr.msra.gmra.mrb[16].mxu0 %v9055_v23 }
 0x737   : > { %12324 = vmatpush3.bf16.xpose.msra.mxu0 %v12323_v25  ;;  %12052 = vmatprep.mubr.msk.f32.mxu0 %vm12958_vm4, %v12959_v17 }
 0x738   : > { %12325 = vmatprep.subr.bf16.mxu0 %v12957_v15 }
 0x73e   : > { %12053 = vmatmul.mubr.f32.vlgmr.msra.gmra.mrb[16].mxu0 %v9056_v42 }
 0x73f   : > { %12327 = vmatpush3.bf16.xpose.msra.mxu0 %v14028_v34  ;;  %12059 = vmatprep.mubr.msk.f32.mxu0 %vm12958_vm4, %v12959_v17 }
 0x740   : > { %12328 = vmatprep.subr.bf16.mxu0 %v12957_v15 }
 0x746   : > { %12060 = vmatmul.mubr.f32.vlgmr.msra.gmra.mrb[16].mxu0 %v9057_v54 }
 0x747   : > { %12330 = vmatpush3.bf16.xpose.msra.mxu0 %v12329_v32  ;;  %12066 = vmatprep.mubr.msk.f32.mxu0 %vm12958_vm4, %v12959_v17 }
 0x748   : > { %12331 = vmatprep.subr.bf16.mxu0 %v12957_v15 }
 0x74e   : > { %12067 = vmatmul.mubr.f32.vlgmr.msra.gmra.mrb[16].mxu0 %v9055_v23 }
 0x74f   : > { %12333 = vmatpush3.bf16.xpose.msra.mxu0 %v14028_v34  ;;  %12073 = vmatprep.mubr.msk.f32.mxu0 %vm12958_vm4, %v12959_v17 }
 0x756   : > { %12074 = vmatmul.mubr.f32.vlgmr.msra.gmra.mrb[16].mxu0 %v9055_v23 }
 0x75e   : > { %v9495_v29 = vpop.trf.xlu0 }
 0x762   : > { %v9496_v2 = vpop.trf.xlu0 }
 0x787   : > { %v9527_v46 = vpop.trf.xlu1 }
 0x788   : > { %v9703_v9 = vcombine.low %v9463_v58, %v9527_v46  ;;  %v9704_v15 = vcombine.high %v9463_v58, %v9527_v46 }
 0x78a   : > { %v9711_v17 = vrot.slane %v9703_v9, %v14065_v6  ;;  %v9718_v0 = vrot.slane %v9704_v15, %v14065_v6 }
 0x78b   : > { %v9528_v27 = vpop.trf.xlu1 }
 0x78c   : > { %v9839_v10 = vcombine.low %v9464_v37, %v9528_v27  ;;  %v9840_v33 = vcombine.high %v9464_v37, %v9528_v27 }
 0x78e   : > { %v9847_v11 = vrot.slane %v9839_v10, %v14065_v6  ;;  %v9854_v57 = vrot.slane %v9840_v33, %v14065_v6 }
 0x78f   : > { %v9559_v31 = vpop.trf.xlu1 }
 0x790   : > { %v9719_v59 = vcombine.low %v9495_v29, %v9559_v31  ;;  %v9720_v51 = vcombine.high %v9495_v29, %v9559_v31 }
 0x792   : > { %v9727_v41 = vrot.slane %v9719_v59, %v14065_v6  ;;  %v9734_v34 = vrot.slane %v9720_v51, %v14065_v6 }
 0x793   : > { %v9560_v22 = vpop.trf.xlu1 }
 0x794   : > { %v9767_v40 = vcombine.low %v9711_v17, %v9727_v41  ;;  %v9768_v45 = vcombine.high %v9711_v17, %v9727_v41  ;;  %v9783_v4 = vcombine.low %v9718_v0, %v9734_v34  ;;  %v9784_v49 = vcombine.high %v9718_v0, %v9734_v34 }
 0x795   : > { %v9855_v1 = vcombine.low %v9496_v2, %v9560_v22  ;;  %v9856_v18 = vcombine.high %v9496_v2, %v9560_v22 }
 0x796   : > { %v9775_v38 = vrot.slane %v9767_v40, %v14071_v36  ;;  %v9782_v24 = vrot.slane %v9768_v45, %v14071_v36  ;;  %v9791_v3 = vrot.slane %v9783_v4, %v14071_v36  ;;  %v9798_v16 = vrot.slane %v9784_v49, %v14071_v36 }
 0x797   : > { %v9863_v5 = vrot.slane %v9855_v1, %v14065_v6  ;;  %v9870_v19 = vrot.slane %v9856_v18, %v14065_v6 }
 0x798   : > { %v11048_v50 = vcombine.low %v9775_v38, %v9782_v24  ;;  %v11050_v47 = vcombine.high %v9775_v38, %v9782_v24  ;;  %v11052_v48 = vcombine.low %v9791_v3, %v9798_v16  ;;  %v11054_v44 = vcombine.high %v9791_v3, %v9798_v16 }
 0x799   : > { %v9903_v20 = vcombine.low %v9847_v11, %v9863_v5  ;;  %v9904_v7 = vcombine.high %v9847_v11, %v9863_v5  ;;  %v9919_v63 = vcombine.low %v9854_v57, %v9870_v19  ;;  %v9920_v13 = vcombine.high %v9854_v57, %v9870_v19 }
 0x79a   : > { %v9983_v55 = vrot.slane %v11048_v50, %v14065_v6  ;;  %v9999_v26 = vrot.slane %v11050_v47, %v14065_v6  ;;  %v10015_v23 = vrot.slane %v11052_v48, %v14065_v6  ;;  %v10031_v60 = vrot.slane %v11054_v44, %v14065_v6 }
 0x79b   : > { %v9911_v42 = vrot.slane %v9903_v20, %v14071_v36  ;;  %v9918_v56 = vrot.slane %v9904_v7, %v14071_v36  ;;  %v9927_v54 = vrot.slane %v9919_v63, %v14071_v36  ;;  %v9934_v30 = vrot.slane %v9920_v13, %v14071_v36 }
 0x79c   : > { %v10039_v21 = vcombine.low %v9983_v55, %v9999_v26  ;;  %v10071_v14 = vcombine.low %v10015_v23, %v10031_v60  ;;  %v10040_v53 = vcombine.high %v9983_v55, %v9999_v26  ;;  %v10072_v62 = vcombine.high %v10015_v23, %v10031_v60 }
 0x79d   : > { %v11056_v25 = vcombine.low %v9911_v42, %v9918_v56  ;;  %v11058_v32 = vcombine.high %v9911_v42, %v9918_v56  ;;  %v11060_v58 = vcombine.low %v9927_v54, %v9934_v30  ;;  %v11062_v35 = vcombine.high %v9927_v54, %v9934_v30 }
 0x79e   : > { %v10047_v52 = vrot.slane %v10039_v21, %v14071_v36  ;;  %v10079_v8 = vrot.slane %v10071_v14, %v14071_v36  ;;  %v10054_v37 = vrot.slane %v10040_v53, %v14071_v36  ;;  %v10086_v46 = vrot.slane %v10072_v62, %v14071_v36 }
 0x79f   : > { %v10119_v28 = vrot.slane %v11056_v25, %v14065_v6  ;;  %v10135_v12 = vrot.slane %v11058_v32, %v14065_v6  ;;  %v10151_v27 = vrot.slane %v11060_v58, %v14065_v6  ;;  %v10167_v39 = vrot.slane %v11062_v35, %v14065_v6 }
 0x7a0   : > { %v10106_v61 = vcombine.high %v10054_v37, %v10086_v46  ;;  %v10105_v9 = vcombine.low %v10054_v37, %v10086_v46  ;;  %v10103_v15 = vcombine.low %v10047_v52, %v10079_v8  ;;  %v10104_v49 = vcombine.high %v10047_v52, %v10079_v8 }
 0x7a1   : > { %v10175_v29 = vcombine.low %v10119_v28, %v10135_v12  ;;  %v10207_v43 = vcombine.low %v10151_v27, %v10167_v39  ;;  %v10176_v31 = vcombine.high %v10119_v28, %v10135_v12  ;;  %v10208_v17 = vcombine.high %v10151_v27, %v10167_v39 }
 0x7a3   : > { %v14098_v0 = vrot.slane %v10175_v29, %v14071_v36  ;;  %v14101_v59 = vrot.slane %v10207_v43, %v14071_v36  ;;  %v10190_v51 = vrot.slane %v10176_v31, %v14071_v36  ;;  %v10222_v10 = vrot.slane %v10208_v17, %v14071_v36 }
 0x7a5   : > { %v10239_v33 = vcombine.low %v14098_v0, %v14101_v59  ;;  %v10241_v41 = vcombine.low %v10190_v51, %v10222_v10  ;;  %v10242_v34 = vcombine.high %v10190_v51, %v10222_v10  ;;  %v10240_v4 = vcombine.high %v14098_v0, %v14101_v59 }
 0x7b2   : > { %v8507_v2 = vpop.f32.mrb[14].mxu0 }
 0x7b3   : > { %v11991_v22 = vpop.f32.mrb[15].mxu0  ;;  %9607 = vxpose.xlu1.b32.start.end [1/1] (short) (narrow) %v8507_v2, 16 }
 0x7b6   : > { %v8039_v40 = vpop.f32.mrb[14].mxu1 }
 0x7b7   : > { %9575 = vxpose.xlu0.b32.start.end [1/1] (short) (narrow) %v8039_v40, 16  ;;  %v11949_v45 = vpop.f32.mrb[15].mxu1 }
 0x7d5   : > { %10251 = vrot.lane.b32.xlu1 %v10240_v4, %s12962_s15 }
 0x7e4   : > { %10249 = vrot.lane.b32.xlu0 %v10104_v49, %s12962_s15  ;;  %s11073_s15 = sshll.u32 %s13037_s9, 8  ;;  %s10917_s9 = scalar_lea.sflag [#allocation4], %s13221_s12 }
 0x7f3   : > { %v8975_v11 = vpop.f32.mrb[16].mxu1 }
 0x7f4   : > { %v12033_v57 = vpop.f32.mrb[17].mxu1 }
 0x802   : > { %9639 = vxpose.xlu0.b32.start.end [1/1] (short) (narrow) %v8975_v11, 16 }
 0x829   : > { %v9443_v1 = vpop.f32.mrb[16].mxu0 }
 0x82a   : > { %v12075_v18 = vpop.f32.mrb[17].mxu0  ;;  %9671 = vxpose.xlu1.b32.start.end [1/1] (short) (narrow) %v9443_v1, 16 }
 0x82f   : > { %10265 = vrot.lane.b32.xlu0 %v10106_v61, %s12963_s11 }
 0x833   : > { %v9623_v5 = vpop.trf.xlu1 }
 0x837   : > { %v9591_v38 = vpop.trf.xlu0  ;;  %v9624_v19 = vpop.trf.xlu1 }
 0x83b   : > { %v9592_v24 = vpop.trf.xlu0 }
 0x847   : > { %v14114_v50 = vpop.permute.xlu1 %10251 }
 0x84c   : > { %10257 = vrot.lane.b32.xlu1 %v10105_v9, %s12964_s13 }
 0x850   : > { %10259 = vrot.lane.b32.xlu1 %v10241_v41, %s12964_s13 }
 0x854   : > { %10267 = vrot.lane.b32.xlu1 %v10242_v34, %s12963_s11  ;;  %s367_s11 = scalar_lea.vmem [#allocation10], %s11042_s10  ;;  %s12969_s10 = smov [#allocation10]  }
 0x855   : > { %s12870_s24 = sshll.u32 %s12969_s10, 4  ;;  %s12871_s24 = int_to_ptr.vmem [resolvable:$false] %s12870_s24 }
 0x856   : > { %v10250_v3 = vpop.permute.xlu0 %10249 }
 0x857   : > { %v14112_v16 = vsel %vm1252_vm1, %v10103_v15, %v10250_v3 }
 0x882   : > { %v9655_v47 = vpop.trf.xlu0 }
 0x883   : > { %v9735_v48 = vcombine.low %v9591_v38, %v9655_v47  ;;  %v9736_v44 = vcombine.high %v9591_v38, %v9655_v47 }
 0x885   : > { %v9743_v13 = vrot.slane %v9735_v48, %v14065_v6  ;;  %v9750_v55 = vrot.slane %v9736_v44, %v14065_v6 }
 0x886   : > { %v9656_v26 = vpop.trf.xlu0 }
 0x887   : > { %v9871_v42 = vcombine.low %v9592_v24, %v9656_v26  ;;  %v9872_v56 = vcombine.high %v9592_v24, %v9656_v26 }
 0x889   : > { %v9879_v8 = vrot.slane %v9871_v42, %v14065_v6  ;;  %v9886_v37 = vrot.slane %v9872_v56, %v14065_v6  ;;  %v10323_v56 = vld [vmem:[#allocation8 + $0x8] sm:$0xff] }
 0x8aa   : > { %v9687_v20 = vpop.trf.xlu1 }
 0x8ab   : > { %v9751_v7 = vcombine.low %v9623_v5, %v9687_v20  ;;  %v9752_v63 = vcombine.high %v9623_v5, %v9687_v20 }
 0x8ad   : > { %v9759_v23 = vrot.slane %v9751_v7, %v14065_v6  ;;  %v9766_v60 = vrot.slane %v9752_v63, %v14065_v6 }
 0x8ae   : > { %v9688_v54 = vpop.trf.xlu1 }
 0x8af   : > { %v9799_v30 = vcombine.low %v9743_v13, %v9759_v23  ;;  %v9800_v21 = vcombine.high %v9743_v13, %v9759_v23  ;;  %v9815_v14 = vcombine.low %v9750_v55, %v9766_v60  ;;  %v9816_v53 = vcombine.high %v9750_v55, %v9766_v60 }
 0x8b0   : > { %v9887_v62 = vcombine.low %v9624_v19, %v9688_v54  ;;  %v9888_v25 = vcombine.high %v9624_v19, %v9688_v54 }
 0x8b1   : > { %v9807_v32 = vrot.slane %v9799_v30, %v14071_v36  ;;  %v9814_v58 = vrot.slane %v9800_v21, %v14071_v36  ;;  %v9823_v35 = vrot.slane %v9815_v14, %v14071_v36  ;;  %v9830_v52 = vrot.slane %v9816_v53, %v14071_v36 }
 0x8b2   : > { %v9895_v46 = vrot.slane %v9887_v62, %v14065_v6  ;;  %v9902_v28 = vrot.slane %v9888_v25, %v14065_v6  ;;  %v10343_v30 = vand.u32 4294901760, %v10323_v56 }
 0x8b3   : > { %v11049_v12 = vcombine.low %v9807_v32, %v9814_v58  ;;  %v11051_v27 = vcombine.high %v9807_v32, %v9814_v58  ;;  %v11053_v39 = vcombine.low %v9823_v35, %v9830_v52  ;;  %v11055_v61 = vcombine.high %v9823_v35, %v9830_v52  ;;  %v10324_v35 = vld [vmem:[#allocation8 + $0x10] sm:$0xff]  ;;  %v10325_v52 = vld [vmem:[#allocation8 + $0x18] sm:$0xff] }
 0x8b4   : > { %v9935_v9 = vcombine.low %v9879_v8, %v9895_v46  ;;  %v9936_v15 = vcombine.high %v9879_v8, %v9895_v46  ;;  %v9951_v29 = vcombine.low %v9886_v37, %v9902_v28  ;;  %v9952_v43 = vcombine.high %v9886_v37, %v9902_v28 }
 0x8b5   : > { %v9990_v31 = vrot.slane %v11049_v12, %v14065_v6  ;;  %v10006_v17 = vrot.slane %v11051_v27, %v14065_v6  ;;  %v10022_v51 = vrot.slane %v11053_v39, %v14065_v6  ;;  %v10038_v10 = vrot.slane %v11055_v61, %v14065_v6 }
 0x8b6   : > { %v9943_v41 = vrot.slane %v9935_v9, %v14071_v36  ;;  %v9950_v34 = vrot.slane %v9936_v15, %v14071_v36  ;;  %v9959_v2 = vrot.slane %v9951_v29, %v14071_v36  ;;  %v9966_v22 = vrot.slane %v9952_v43, %v14071_v36 }
 0x8b7   : > { %v10055_v40 = vcombine.low %v9990_v31, %v10006_v17  ;;  %v10087_v45 = vcombine.low %v10022_v51, %v10038_v10  ;;  %v10056_v47 = vcombine.high %v9990_v31, %v10006_v17  ;;  %v10088_v48 = vcombine.high %v10022_v51, %v10038_v10 }
 0x8b8   : > { %v11057_v4 = vcombine.low %v9943_v41, %v9950_v34  ;;  %v11059_v49 = vcombine.high %v9943_v41, %v9950_v34  ;;  %v11061_v11 = vcombine.low %v9959_v2, %v9966_v22  ;;  %v11063_v57 = vcombine.high %v9959_v2, %v9966_v22 }
 0x8b9   : > { %v10063_v1 = vrot.slane %v10055_v40, %v14071_v36  ;;  %v10095_v18 = vrot.slane %v10087_v45, %v14071_v36  ;;  %v10070_v55 = vrot.slane %v10056_v47, %v14071_v36  ;;  %v10102_v26 = vrot.slane %v10088_v48, %v14071_v36 }
 0x8ba   : > { %v10126_v38 = vrot.slane %v11057_v4, %v14065_v6  ;;  %v10142_v24 = vrot.slane %v11059_v49, %v14065_v6  ;;  %v10158_v3 = vrot.slane %v11061_v11, %v14065_v6  ;;  %v10174_v5 = vrot.slane %v11063_v57, %v14065_v6  ;;  %v10322_v6 = vld [vmem:[#allocation8] sm:$0xff] }
 0x8bb   : > { %v10107_v19 = vcombine.low %v10063_v1, %v10095_v18  ;;  %v10108_v13 = vcombine.high %v10063_v1, %v10095_v18  ;;  %v10340_v54 = vand.u32 4294901760, %v10322_v6  ;;  %v10109_v21 = vcombine.low %v10070_v55, %v10102_v26  ;;  %v10266_v18 = vpop.permute.xlu0 %10265 }
 0x8bc   : > { %v10191_v44 = vcombine.low %v10126_v38, %v10142_v24  ;;  %v10223_v20 = vcombine.low %v10158_v3, %v10174_v5  ;;  %v10192_v60 = vcombine.high %v10126_v38, %v10142_v24  ;;  %v10224_v42 = vcombine.high %v10158_v3, %v10174_v5 }
 0x8bd   : > { %10273 = vrot.lane.b32.xlu0 %v10107_v19, %s12965_s19  ;;  %v14146_v14 = vpack.c.bf16 %v10343_v30, %v10340_v54  ;;  %v10430_v53 = vsub.f32 %v10322_v6, %v10340_v54  ;;  %v10437_v62 = vsub.f32 %v10323_v56, %v10343_v30  ;;  %v10346_v8 = vand.u32 4294901760, %v10324_v35 }
 0x8be   : > { %v10199_v7 = vrot.slane %v10191_v44, %v14071_v36  ;;  %v10231_v63 = vrot.slane %v10223_v20, %v14071_v36  ;;  %v10206_v32 = vrot.slane %v10192_v60, %v14071_v36  ;;  %v10238_v58 = vrot.slane %v10224_v42, %v14071_v36  ;;  %v10258_v57 = vpop.permute.xlu1 %10257 }
 0x8bf   : > { %12335 = vmatprep.subr.bf16.mxu1 %v14146_v14  ;;  %v10349_v37 = vand.u32 4294901760, %v10325_v52  ;;  %v10431_v46 = vand.u32 4294901760, %v10430_v53  ;;  %v10438_v28 = vand.u32 4294901760, %v10437_v62  ;;  %v10110_v12 = vcombine.high %v10070_v55, %v10102_v26 }
 0x8c0   : > { %v10243_v23 = vcombine.low %v10199_v7, %v10231_v63  ;;  %v10244_v25 = vcombine.high %v10199_v7, %v10231_v63  ;;  %12337 = vmatpush3.bf16.msra.mxu1 %v14146_v14  ;;  %v10245_v9 = vcombine.low %v10206_v32, %v10238_v58  ;;  %v10444_v36 = vsub.f32 %v10324_v35, %v10346_v8 }
 0x8c1   : > { %10281 = vrot.lane.b32.xlu0 %v10108_v13, %s12966_s21  ;;  %v14152_v27 = vpack.c.bf16 %v10349_v37, %v10346_v8  ;;  %v10432_v39 = vsub.f32 %v10430_v53, %v10431_v46  ;;  %v10439_v61 = vsub.f32 %v10437_v62, %v10438_v28  ;;  %v10451_v15 = vsub.f32 %v10325_v52, %v10349_v37  ;;  %v11064_v8 = vld [vmem:[%s14265_s5] ss:$0 sm:$0xff] }
 0x8c2   : > { %10275 = vrot.lane.b32.xlu1 %v10243_v23, %s12965_s19  ;;  %v10445_v31 = vand.u32 4294901760, %v10444_v36  ;;  %v10246_v10 = vcombine.high %v10206_v32, %v10238_v58  ;;  %v12350_v45 = vpack.c.bf16 %v10437_v62, %v10430_v53  ;;  %v14156_v49 = vpack.c.bf16 %v10438_v28, %v10431_v46  ;;  %v10260_v1 = vpop.permute.xlu1 %10259  ;;  %s10930_s19 = sshll.u32 %s367_s11, 4  ;;  %s14214_s19 = int_to_ptr.vmem [resolvable:$true] %s10930_s19 }
 0x8c3   : > { %12339 = vmatprep.subr.bf16.mxu1 %v14152_v27  ;;  %v10433_v29 = vand.u32 4294901760, %v10432_v39  ;;  %v10440_v43 = vand.u32 4294901760, %v10439_v61  ;;  %v10452_v17 = vand.u32 4294901760, %v10451_v15  ;;  %v12354_v4 = vpack.c.bf16 %v10451_v15, %v10444_v36  ;;  %v12750_v39 = vld [vmem:[%s13227_s27 + $0x8] sm:$0xff]  ;;  %s12866_s16 = scalar_lea.vmem %s14214_s19, 256  ;;  %p12873_p12 = scmp.lt.s32.totalorder %s14214_s19, %s12871_s24 }
 0x8c4   : > { %12341 = vmatpush3.bf16.msra.mxu1 %v14152_v27  ;;  %v10446_v41 = vsub.f32 %v10444_v36, %v10445_v31  ;;  %v10306_v19 = vsel %vm10305_vm5, %v14112_v16, %v10258_v57  ;;  %v10304_v63 = vsel %vm1252_vm1, %v10239_v33, %v14114_v50  ;;  %p12867_p10 = scmp.ne.s32.totalorder %s14214_s19, %s12866_s16 }
 0x8c5   : > { %10289 = vrot.lane.b32.xlu0 %v10109_v21, %s12967_s17  ;;  %v12342_v51 = vpack.c.bf16 %v10440_v43, %v10433_v29  ;;  %v10453_v34 = vsub.f32 %v10451_v15, %v10452_v17  ;;  %v14158_v11 = vpack.c.bf16 %v10452_v17, %v10445_v31  ;;  %v10309_v48 = vsel %vm10308_vm6, %v10306_v19, %v10266_v18 }
 0x8c6   : > { %10283 = vrot.lane.b32.xlu1 %v10244_v25, %s12966_s21  ;;  %v10447_v2 = vand.u32 4294901760, %v10446_v41  ;;  %v10268_v24 = vpop.permute.xlu1 %10267  ;;  %v10307_v55 = vsel %vm10305_vm5, %v10304_v63, %v10260_v1  ;;  %v11065_v1 = vld [vmem:[%s14266_s6] ss:$0 sm:$0xff]  ;;  %p12868_p3 = pnand %p12867_p10, %p13170_p5 }
 0x8c7   : > { %12343 = vmatprep.subr.bf16.mxu1 %v12342_v51  ;;  %v10454_v22 = vand.u32 4294901760, %v10453_v34  ;;  %v10310_v60 = vsel %vm10308_vm6, %v10307_v55, %v10268_v24 }
 0x8c8   : > { %p12869_p7 = pneg %p12868_p3 }
 0x8c9   : > { %10297 = vrot.lane.b32.xlu0 %v10110_v12, %s12968_s18  ;;  %v12346_v40 = vpack.c.bf16 %v10454_v22, %v10447_v2 }
 0x8ca   : > { %10291 = vrot.lane.b32.xlu1 %v10245_v9, %s12967_s17  ;;  %v12751_v9 = vld [vmem:[%s13227_s27] sm:$0xff]  ;;  %s12872_s27 = scalar_lea.vmem %s12871_s24, 512 }
 0x8cb   : > { %p12874_p1 = scmp.lt.s32.totalorder %s12872_s27, %s12866_s16 }
 0x8cd   : > { %p12875_p2 = por %p12874_p1, %p12873_p12 }
 0x8ce   : > { %10299 = vrot.lane.b32.xlu1 %v10246_v10, %s12968_s18  ;;  %s14212_s18 = scalar_lea.hbm %s14268_s8, %s11073_s15 }
 0x8cf   : > { %p12876_p4 = pnand %p12875_p2, %p12869_p7 }
 0x92f   : > { %v10274_v38 = vpop.permute.xlu0 %10273 }
 0x930   : > { %v10311_v20 = vsel %vm5222_vm3, %v10309_v48, %v10274_v38  ;;  %v11066_v38 = vld [vmem:[%s14267_s7] ss:$0 sm:$0xff] }
 0x933   : > { %v10282_v3 = vpop.permute.xlu0 %10281 }
 0x934   : > { %v10276_v5 = vpop.permute.xlu1 %10275  ;;  %v10314_v7 = vsel %vm10313_vm7, %v10311_v20, %v10282_v3 }
 0x935   : > { %v10312_v6 = vsel %vm5222_vm3, %v10310_v60, %v10276_v5 }
 0x937   : > { %v10290_v47 = vpop.permute.xlu0 %10289 }
 0x938   : > { %v10284_v44 = vpop.permute.xlu1 %10283  ;;  %v10317_v13 = vsel %vm10316_vm8, %v10314_v7, %v10290_v47 }
 0x939   : > { %v10315_v54 = vsel %vm10313_vm7, %v10312_v6, %v10284_v44 }
 0x93b   : > { %v10298_v16 = vpop.permute.xlu0 %10297 }
 0x93c   : > { %v10320_v26 = vsel %vm10319_vm9, %v10317_v13, %v10298_v16  ;;  %v10292_v23 = vpop.permute.xlu1 %10291 }
 0x93d   : > { %v10334_v42 = vsel %vm381_vm0, %v10320_v26, 0  ;;  %v10318_v0 = vsel %vm10316_vm8, %v10315_v54, %v10292_v23 }
 0x93e   : > { %v10408_v56 = vand.u32 4294901760, %v10334_v42 }
 0x940   : > { %v10409_v30 = vsub.f32 %v10334_v42, %v10408_v56  ;;  %v10300_v59 = vpop.permute.xlu1 %10299 }
 0x941   : > { %v10321_v33 = vsel %vm10319_vm9, %v10318_v0, %v10300_v59 }
 0x942   : > { %v10337_v50 = vsel %vm381_vm0, %v10321_v33, 0  ;;  %v10410_v21 = vand.u32 4294901760, %v10409_v30 }
 0x943   : > { %v10418_v53 = vand.u32 4294901760, %v10337_v50 }
 0x944   : > { %v10411_v62 = vsub.f32 %v10409_v30, %v10410_v21 }
 0x945   : > { %v10419_v25 = vsub.f32 %v10337_v50, %v10418_v53 }
 0x946   : > { %v10412_v32 = vand.u32 4294901760, %v10411_v62 }
 0x947   : > { %v10420_v58 = vand.u32 4294901760, %v10419_v25 }
 0x948   : > { %12084 = vmatprep.mubr.f32.mxu1 %v10412_v32 }
 0x949   : > { %v10421_v35 = vsub.f32 %v10419_v25, %v10420_v58 }
 0x94b   : > { %v10422_v52 = vand.u32 4294901760, %v10421_v35 }
 0x94d   : > { %12085 = vmatmul.mubr.f32.vlgmr.msra.gmra.mrb[18].mxu1 %v10422_v52 }
 0x94e   : > { %12345 = vmatpush3.bf16.msra.mxu1 %v12342_v51  ;;  %12095 = vmatprep.mubr.f32.mxu1 %v10408_v56 }
 0x94f   : > { %12347 = vmatprep.subr.bf16.mxu1 %v12346_v40 }
 0x952   : > { %12349 = vmatpush3.bf16.msra.mxu1 %v12346_v40 }
 0x953   : > { %12351 = vmatprep.subr.bf16.mxu1 %v12350_v45 }
 0x955   : > { %12096 = vmatmul.mubr.f32.vlgmr.msra.gmra.mrb[18].mxu1 %v10418_v53 }
 0x956   : > { %12353 = vmatpush3.bf16.msra.mxu1 %v12350_v45  ;;  %12106 = vmatprep.mubr.f32.mxu1 %v10409_v30 }
 0x957   : > { %12355 = vmatprep.subr.bf16.mxu1 %v12354_v4 }
 0x95a   : > { %12357 = vmatpush3.bf16.msra.mxu1 %v12354_v4 }
 0x95b   : > { %12359 = vmatprep.subr.bf16.mxu1 %v14146_v14 }
 0x95d   : > { %12107 = vmatmul.mubr.f32.vlgmr.msra.gmra.mrb[18].mxu1 %v10419_v25 }
 0x95e   : > { %12361 = vmatpush3.bf16.msra.mxu1 %v14146_v14  ;;  %12117 = vmatprep.mubr.f32.mxu1 %v10410_v21 }
 0x95f   : > { %12363 = vmatprep.subr.bf16.mxu1 %v14152_v27 }
 0x962   : > { %12365 = vmatpush3.bf16.msra.mxu1 %v14152_v27 }
 0x963   : > { %12367 = vmatprep.subr.bf16.mxu1 %v14156_v49 }
 0x965   : > { %12118 = vmatmul.mubr.f32.vlgmr.msra.gmra.mrb[18].mxu1 %v10420_v58 }
 0x966   : > { %12369 = vmatpush3.bf16.msra.mxu1 %v14156_v49  ;;  %12128 = vmatprep.mubr.f32.mxu1 %v10408_v56 }
 0x967   : > { %12371 = vmatprep.subr.bf16.mxu1 %v14158_v11 }
 0x96a   : > { %12373 = vmatpush3.bf16.msra.mxu1 %v14158_v11 }
 0x96b   : > { %12375 = vmatprep.subr.bf16.mxu1 %v14146_v14 }
 0x96d   : > { %12129 = vmatmul.mubr.f32.vlgmr.msra.gmra.mrb[18].mxu1 %v10418_v53 }
 0x96e   : > { %12377 = vmatpush3.bf16.msra.mxu1 %v14146_v14  ;;  %12139 = vmatprep.mubr.f32.mxu1 %v10408_v56 }
 0x96f   : > { %12379 = vmatprep.subr.bf16.mxu1 %v14152_v27 }
 0x972   : > { %12381 = vmatpush3.bf16.msra.mxu1 %v14152_v27 }
 0x975   : > { %12140 = vmatmul.mubr.f32.vlgmr.msra.gmra.mrb[18].mxu1 %v10418_v53 }
 0xa48   : > { %v12141_v37 = vpop.f32.mrb[18].mxu1 }
 0xa49   : > { %v12401_v46 = vadd.f32 %v12141_v37, %v11064_v8  ;;  %v10857_v28 = vpop.f32.mrb[19].mxu1 }
 0xa4a   : > { %v12402_v12 = vadd.f32 %v11064_v8, %v10857_v28 }
 0xa4b   : > { %v10868_v61 = vadd.f32 %v12750_v39, %v12401_v46 }
 0xa4c   : > { %v10867_v36 = vadd.f32 %v12751_v9, %v12402_v12 }
 0xa4d   : > { %v10872_v14 = vsel %vm381_vm0, %v10868_v61, 0.0 }
 0xa4e   : > { %10873 = vadd.xlane.f32.xlu1 %v10872_v14  ;;  %v10869_v15 = vsel %vm381_vm0, %v10867_v36, 0.0 }
 0xa4f   : > { %10870 = vadd.xlane.f32.xlu0 %v10869_v15 }
 0xadb   : > { %v10874_v27 = vpop.xlane.xlu1 %10873 }
 0xadc   : > { %v10877_v29 = vmul.f32 0.03125, %v10874_v27  ;;  %v10871_v43 = vpop.xlane.xlu0 %10870 }
 0xadd   : > { %v10876_v31 = vmul.f32 0.03125, %v10871_v43 }
 0xade   : > { %v10879_v17 = vsub.f32 %v10868_v61, %v10877_v29 }
 0xadf   : > { %v10878_v51 = vsub.f32 %v10867_v36, %v10876_v31 }
 0xae0   : > { %v10881_v34 = vmul.f32 %v10879_v17, %v10879_v17 }
 0xae1   : > { %v10880_v10 = vmul.f32 %v10878_v51, %v10878_v51 }
 0xae2   : > { %v10885_v2 = vsel %vm381_vm0, %v10881_v34, 0.0 }
 0xae3   : > { %v10882_v41 = vsel %vm381_vm0, %v10880_v10, 0.0 }
 0xae4   : > { %10883 = vadd.xlane.f32.xlu0 %v10882_v41 }
 0xae8   : > { %10886 = vadd.xlane.f32.xlu0 %v10885_v2 }
 0xb71   : > { %v10884_v22 = vpop.xlane.xlu0 %10883 }
 0xb72   : > { %v10888_v40 = vmul.f32 0.03125, %v10884_v22 }
 0xb74   : > { %v10890_v45 = vadd.f32 1e-05, %v10888_v40 }
 0xb75   : > { %v10887_v4 = vpop.xlane.xlu0 %10886 }
 0xb76   : > { %12746 = vrsqrt.f32 %v10890_v45  ;;  %v10889_v49 = vmul.f32 0.03125, %v10887_v4 }
 0xb78   : > { %v10891_v11 = vadd.f32 1e-05, %v10889_v49 }
 0xb7a   : > { %12748 = vrsqrt.f32 %v10891_v11 }
 0xb80   : > { %v12747_v57 = vpop.eup %12746 }
 0xb81   : > { %v10894_v18 = vmul.f32 %v12747_v57, %v10878_v51 }
 0xb83   : > { %v10903_v24 = vmul.f32 %v11065_v1, %v10894_v18 }
 0xb84   : > { %v12749_v3 = vpop.eup %12748 }
 0xb85   : > { %v10912_v5 = vadd.f32 %v11066_v38, %v10903_v24  ;;  %v10895_v19 = vmul.f32 %v12749_v3, %v10879_v17 }
 0xb87   : > { %v10904_v47 = vmul.f32 %v11065_v1, %v10895_v19  ;;  %10914 = vst.msk [vmem:[%s367_s11] sm:$0xff] %vm381_vm0, %v10912_v5 }
 0xb89   : > { %v10913_v48 = vadd.f32 %v11066_v38, %v10904_v47 }
 0xb8b   : > { %10915 = vst.msk [vmem:[%s367_s11 + $0x8] sm:$0xff] %vm381_vm0, %v10913_v48 }
 0xb8c   : > { %12879 = shalt.err (!%p12876_p4)
}
 0xb8d   : > { %s12880_s25 = scalar_lea.hbm %s14212_s18, 256  ;;  %s12884_s15 = scalar_lea.hbm %s14268_s8, 512 }
 0xb8e   : > { %p12881_p9 = scmp.ne.s32.totalorder %s14212_s18, %s12880_s25  ;;  %p12885_p8 = scmp.lt.u32.totalorder %s14212_s18, %s14268_s8 }
 0xb8f   : > { %p12886_p13 = scmp.lt.u32.totalorder %s12884_s15, %s12880_s25  ;;  %p12888_p10 = scmp.lt.u32.totalorder %s12880_s25, %s14212_s18 }
 0xb90   : > { %p12882_p0 = pnand %p12881_p9, %p13170_p5 }
 0xb91   : > { %p12887_p6 = por %p12886_p13, %p12885_p8 }
 0xb92   : > { %p12883_p11 = pneg %p12882_p0 }
 0xb93   : > { %p12889_p3 = por %p12888_p10, %p12887_p6 }
 0xb95   : > { %p12890_p7 = pnand %p12889_p3, %p12883_p11 }
 0xb97   : > { %12893 = shalt.err (!%p12890_p7)
}
 0xb98   : > { %s12970_s17 = smov 128  }
 0xb99   : > { %12595 = dma.vmem_to_hbm [thread:$0]  (%p13170_p5), %s14214_s19, 256, %s14212_s18, %s10917_s9, %s12970_s17, %s12970_s17, %s12964_s13  }
 0xb9a PF: > { %s14290_s16 = sld [smem:[#allocation15_spill]]  ;;  %s14291_s10 = sld [smem:[#allocation16_spill]] }
 0xb9b   : > { %p14293_p1 = scmp.ge.s32.totalorder %s12940_s30, 2 }
 0xba0   : > { %s10945_s24 = sand.u32 1, %s14290_s16   ;;  %p14292_p12 = scmp.ne.s32.totalorder %s14291_s10, 0 }
 0xba1   : > { %s10946_s27 = scalar_lea.sflag [#allocation4], %s10945_s24 }
 0xba2   : > { %p12612_p2 = pnand %p14293_p1, %p14292_p12 }
 0xba4   : > { %12923 = dma.done.wait (!%p12612_p2), %s10946_s27, 256  }
 0xba5   : > { %12925 = vsyncadd (!%p12612_p2), %s10946_s27, 4294967040  ;;  %p23_p4 = scmp.ge.s32.totalorder %s13156_s26, 4   ;;  %s14294_s27 = smov %s12932_s28 }
 0xba6   : > { %s14295_s28 = smov %s12936_s29  ;;  %s14296_s29 = smov %s13166_s22 }
 0xba7   : > { %s14297_s30 = smov %s13156_s26  ;;  %25 = sbr.rel (!%p23_p4) target bundleno = 7 (0x7), region = 109 }
 0xbae   :  { %10951 = vsyncpa [#allocation3], 1 }
 0xbaf   :  { %10953 = vsyncpa [#allocation3 + $0x1], 1 }
 0xbb0   :  { %10954 = vsyncpa [#allocation6], 1 }
 0xbb1   :  { %10955 = vsyncpa [#allocation9], 1 }
 0xbb2   :  { %10956 = vsyncpa [#allocation4], 1 }
 0xbb3   :  { %10958 = vsyncpa [#allocation4 + $0x1], 1 }

</bundles_post_ra>
